<compile_context>
chip_gen: v5e
topology: v5e:2x2
jax: 0.10.0
libtpu: 0.0.40
codegen_flags: <defaults>
</compile_context>

<pallas_src>
import jax
import jax.numpy as jnp
from jax.experimental import pallas as pl
from jax.experimental.pallas import tpu as pltpu

CLASSES = 10
BN_EPS = 1e-5
_LANE = 128


def _round_up(v, m):
    return (v + m - 1) // m * m


# ----------------------------------------------------------------------------
# Fused kernel: one batch tile (nb images, nb % 8 == 0) end to end.
# Layouts inside the kernel:
#   x_ref : (24, nb, 140)   rows=(y_out, n), lanes = dy*28 + x_in   (K-packed)
#   conv  : rows=(y_out, n), cols = parity*128 + x_half*C + c (lane dense)
#   h1    : (12, nb, 128)   lanes = x*6  + c   (zero above 72)
#   h2    : (4,  nb, 128)   lanes = x*16 + c   (zero above 64)
#   out   : (nb, 128)       lanes = class      (zero above CLASSES)
# ----------------------------------------------------------------------------
def _emnist_kernel(x_ref, b1_ref, sh1_ref, b2_ref, sh2_ref,
                   fcw_ref, fcb_ref, fc1w_ref, fc1b_ref,
                   fc2w_ref, fc2b_ref, o_ref):
    nb = x_ref.shape[1]
    f32 = jnp.float32
    bf16 = jnp.bfloat16

    # ---- conv1 (1 -> 6, k=5): ONE K=140 bf16 matmul (dy fused along K,
    # BN scale pre-folded into the weight columns). ---------------------------
    lhs1 = x_ref[...].reshape(24 * nb, 5 * 28).astype(bf16)
    acc1 = jnp.dot(lhs1, b1_ref[...], preferred_element_type=f32)     # (24*nb, 256)

    # ---- maxpool1 on the raw (scaled) accumulator, then shift + ReLU on the
    # 4x smaller pooled tensor (max commutes with +shift and with ReLU). ------
    a1 = acc1.reshape(12, 2, nb, 256)
    a1 = jnp.maximum(a1[:, 0], a1[:, 1]).reshape(12 * nb, 256)        # y pool
    a1 = jnp.maximum(a1[:, 0:128], a1[:, 128:256])                    # x pool (lane halves)
    h1 = jnp.maximum(a1 + sh1_ref[...], 0.0).reshape(12, nb, 128)

    # ---- conv2 (6 -> 16, k=5): pack 5 dy-shifted, 128-lane-aligned slices
    # into one K=640 LHS -> ONE bf16 matmul. ----------------------------------
    lhs2 = jnp.concatenate(
        [h1[dy:dy + 8].reshape(8 * nb, 128) for dy in range(5)],
        axis=-1).astype(bf16)                                          # (8*nb, 640)
    acc2 = jnp.dot(lhs2, b2_ref[...], preferred_element_type=f32)      # (8*nb, 256)

    # ---- maxpool2, then shift + ReLU ----------------------------------------
    a2 = acc2.reshape(4, 2, nb, 256)
    a2 = jnp.maximum(a2[:, 0], a2[:, 1]).reshape(4 * nb, 256)
    a2 = jnp.maximum(a2[:, 0:128], a2[:, 128:256])                     # (4*nb, 128)
    h2 = jnp.maximum(a2 + sh2_ref[...], 0.0).reshape(4, nb, 128)

    # ---- MLP head: fused fc(512->120) as ONE matmul, then fc1, fc2 ----------
    hcat = jnp.concatenate([h2[0], h2[1], h2[2], h2[3]], axis=-1).astype(bf16)
    h = jnp.dot(hcat, fcw_ref[...], preferred_element_type=f32) + fcb_ref[...]
    h = jnp.maximum(h, 0.0).astype(bf16)
    h = jnp.dot(h, fc1w_ref[...], preferred_element_type=f32) + fc1b_ref[...]
    h = jnp.maximum(h, 0.0).astype(bf16)
    o_ref[...] = (jnp.dot(h, fc2w_ref[...], preferred_element_type=f32)
                  + fc2b_ref[...])


# ----------------------------------------------------------------------------
# Weight preprocessing (XLA side, weight-sized only).
# ----------------------------------------------------------------------------
def _banded_conv_weights(w, w_in, col_block):
    """Per-dy banded matrices for conv-as-matmul along the lane (x) axis.

    Returns T of shape (k, w_in*c_in, 2*col_block) such that
        conv[(y, n), p*col_block + h*c_out + co]
            = sum_dy  act[(y+dy, n), x_in*c_in + ci] @ T[dy]
    where output x position xo = 2*h + p.  Columns above h_max*c_out inside
    each parity block are zero padding (keeps every lane slice 128-aligned).
    """
    c_out, c_in, k, _ = w.shape
    w_out = w_in - k + 1
    half = w_out // 2
    dx = jnp.arange(w_in)[:, None] - jnp.arange(w_out)[None, :]     # (w_in, w_out)
    valid = (dx >= 0) & (dx < k)
    taps = w[:, :, :, jnp.clip(dx, 0, k - 1)]                       # (c_out,c_in,k,w_in,w_out)
    taps = jnp.where(valid[None, None, None], taps, 0.0)
    t = taps.transpose(2, 3, 1, 4, 0)                               # (k,w_in,c_in,w_out,c_out)
    t = t.reshape(k, w_in, c_in, half, 2, c_out).transpose(0, 1, 2, 4, 3, 5)
    t = t.reshape(k, w_in * c_in, 2, half * c_out)
    t = jnp.pad(t, ((0, 0), (0, 0), (0, 0), (0, col_block - half * c_out)))
    return t.reshape(k, w_in * c_in, 2 * col_block).astype(jnp.float32)


def _fold_bn(band, conv_b, gamma, beta, mean, var, half, col_block):
    """Fold eval-BN scale into the banded weight columns; return remaining
    per-pooled-column shift (conv bias + BN shift) for the 128-wide half."""
    scale = gamma / jnp.sqrt(var + BN_EPS)
    shift = (conv_b - mean) * scale + beta
    c = scale.shape[0]
    pad = col_block - half * c
    col_scale = jnp.tile(jnp.pad(jnp.tile(scale, half), (0, pad)), 2)   # (2*col_block,)
    col_shift = jnp.pad(jnp.tile(shift, half), (0, pad))                # (col_block,)
    band_scaled = band * col_scale[None, None, :]
    return (band_scaled.astype(jnp.float32),
            col_shift.reshape(1, col_block).astype(jnp.float32))


# ----------------------------------------------------------------------------
# Forward pass.
# ----------------------------------------------------------------------------
def emnist_forward(x, params):
    n = x.shape[0]
    nb = min(128, _round_up(max(n, 1), 8))          # batch tile (sublane axis)
    # Give v7x's second TensorCore a grid step when everything fits one tile.
    if nb % 16 == 0 and _round_up(n, nb) == nb:
        nb //= 2
    n_pad = _round_up(n, nb)

    # input (N,1,28,28) -> K-packed conv1 LHS (24, N_pad, 140): lanes dy*28+x.
    xs = x.astype(jnp.float32).reshape(n, 28, 28)
    xs = jnp.pad(xs, ((0, n_pad - n), (0, 0), (0, 0)))
    xp = jnp.stack([xs[:, dy:dy + 24, :] for dy in range(5)], axis=2)   # (N,24,5,28)
    xp = xp.transpose(1, 0, 2, 3).reshape(24, n_pad, 5 * 28)

    w1, cb1, g1, be1, m1, v1 = params["layer1"]
    w2, cb2, g2, be2, m2, v2 = params["layer2"]

    band1 = _banded_conv_weights(w1, 28, _LANE)                      # (5, 28, 256)
    band1, sh1 = _fold_bn(band1, cb1, g1, be1, m1, v1, 12, _LANE)
    band1 = band1.reshape(5 * 28, 2 * _LANE).astype(jnp.bfloat16)    # (140, 256)

    band2 = _banded_conv_weights(w2, 12, _LANE)                      # (5, 72, 256)
    band2, sh2 = _fold_bn(band2, cb2, g2, be2, m2, v2, 4, _LANE)
    band2 = jnp.pad(band2, ((0, 0), (0, _LANE - band2.shape[1]), (0, 0)))   # (5,128,256)
    band2 = band2.reshape(5 * _LANE, 2 * _LANE).astype(jnp.bfloat16)        # (640, 256)

    # fc: permute rows from PyTorch NCHW flatten order (c*16 + y*4 + x) to the
    # on-chip fused layout (rows = y*128 + x*16 + c), zero rows above 64 per y.
    fcw = params["fc_w"].reshape(16, 4, 4, 120).transpose(1, 2, 0, 3).reshape(4, 64, 120)
    fcw = jnp.pad(fcw, ((0, 0), (0, _LANE - 64), (0, 0)))
    fcw = fcw.reshape(4 * _LANE, 120).astype(jnp.bfloat16)           # (512, 120)
    fcb = params["fc_b"].reshape(1, 120).astype(jnp.float32)
    fc1w = params["fc1_w"].astype(jnp.bfloat16)                      # (120, 84)
    fc1b = params["fc1_b"].reshape(1, 84).astype(jnp.float32)
    classes = params["fc2_w"].shape[1]
    fc2w = jnp.pad(params["fc2_w"], ((0, 0), (0, _LANE - classes))).astype(jnp.bfloat16)
    fc2b = jnp.pad(params["fc2_b"].reshape(1, classes),
                   ((0, 0), (0, _LANE - classes))).astype(jnp.float32)

    grid = (n_pad // nb,)
    flops = 2 * n_pad * (24 * 140 * 256 + 8 * 640 * 256
                         + 512 * 120 + 120 * 84 + 84 * 128)
    bytes_accessed = (4 * (xp.size + n_pad * _LANE)
                      + 2 * (band1.size + band2.size + fcw.size + fc1w.size + fc2w.size)
                      + 4 * (2 * _LANE + 120 + 84 + 128))

    out = pl.pallas_call(
        _emnist_kernel,
        out_shape=jax.ShapeDtypeStruct((n_pad, _LANE), jnp.float32),
        grid_spec=pltpu.PrefetchScalarGridSpec(
            num_scalar_prefetch=0,
            grid=grid,
            in_specs=[
                pl.BlockSpec((24, nb, 5 * 28), lambda i: (0, i, 0)),    # packed input tile
                pl.BlockSpec((5 * 28, 2 * _LANE), lambda i: (0, 0)),    # conv1 fused banded w
                pl.BlockSpec((1, _LANE), lambda i: (0, 0)),             # shift1
                pl.BlockSpec((5 * _LANE, 2 * _LANE), lambda i: (0, 0)),  # conv2 fused banded w
                pl.BlockSpec((1, _LANE), lambda i: (0, 0)),             # shift2
                pl.BlockSpec((4 * _LANE, 120), lambda i: (0, 0)),       # fc fused
                pl.BlockSpec((1, 120), lambda i: (0, 0)),
                pl.BlockSpec((120, 84), lambda i: (0, 0)),
                pl.BlockSpec((1, 84), lambda i: (0, 0)),
                pl.BlockSpec((84, _LANE), lambda i: (0, 0)),
                pl.BlockSpec((1, _LANE), lambda i: (0, 0)),
            ],
            out_specs=pl.BlockSpec((nb, _LANE), lambda i: (i, 0)),
        ),
        compiler_params=pltpu.CompilerParams(
            dimension_semantics=("parallel",),
            vmem_limit_bytes=32 * 1024 * 1024,   # safe on v7x (64 MiB phys); raise on v5e/v6e if nb grows
        ),
        cost_estimate=pl.CostEstimate(flops=int(flops), transcendentals=0,
                                      bytes_accessed=int(bytes_accessed)),
    )(xp, band1, sh1, band2, sh2, fcw, fcb, fc1w, fc1b, fc2w, fc2b)

    return out[:n, :classes]


def init_params(key, classes):
    ks = jax.random.split(key, 16)

    def conv_params(kw, kb, kg, kbe, km, kv, cout, cin, ksz):
        return (
            jax.random.normal(kw, (cout, cin, ksz, ksz), jnp.float32) * 0.1,
            jax.random.normal(kb, (cout,), jnp.float32) * 0.1,
            1.0 + 0.1 * jax.random.normal(kg, (cout,), jnp.float32),   # gamma
            jax.random.normal(kbe, (cout,), jnp.float32) * 0.1,        # beta
            jax.random.normal(km, (cout,), jnp.float32) * 0.1,         # running_mean
            jax.random.uniform(kv, (cout,), jnp.float32, 0.5, 1.5),    # running_var
        )

    def linear_params(kw, kb, fan_in, fan_out):
        w = jax.random.normal(kw, (fan_in, fan_out), jnp.float32) * 0.05
        b = jax.random.normal(kb, (1, fan_out), jnp.float32) * 0.05
        return w, b

    p = {}
    p["layer1"] = conv_params(*ks[0:6], 6, 1, 5)
    p["layer2"] = conv_params(*ks[6:12], 16, 6, 5)
    p["fc_w"], p["fc_b"] = linear_params(ks[12], ks[13], 256, 120)
    p["fc1_w"], p["fc1_b"] = linear_params(ks[14], ks[15], 120, 84)
    k2w, k2b = jax.random.split(jax.random.fold_in(key, 99))
    p["fc2_w"], p["fc2_b"] = linear_params(k2w, k2b, 84, classes)
    return p


if __name__ == "__main__":
    key = jax.random.PRNGKey(0)
    kx, kp = jax.random.split(key)
    # fc expects 256 = 16*4*4 features => 28x28 single-channel input (EMNIST).
    x = jax.random.normal(kx, (2, 1, 28, 28), jnp.float32)
    params = init_params(kp, CLASSES)

    logits = jax.jit(emnist_forward)(x, params)
    jax.block_until_ready(logits)
    assert logits.shape == (2, CLASSES)
    print("KERNEL_OK")
</pallas_src>

<mosaic_0001>
module attributes {stable_mosaic.version = 11 : i64} {
  func.func @_emnist_kernel(%arg0: i32, %arg1: memref<24x8x140xf32, #tpu.memory_space<vmem>>, %arg2: memref<140x256xbf16, #tpu.memory_space<vmem>>, %arg3: memref<1x128xf32, #tpu.memory_space<vmem>>, %arg4: memref<640x256xbf16, #tpu.memory_space<vmem>>, %arg5: memref<1x128xf32, #tpu.memory_space<vmem>>, %arg6: memref<512x120xbf16, #tpu.memory_space<vmem>>, %arg7: memref<1x120xf32, #tpu.memory_space<vmem>>, %arg8: memref<120x84xbf16, #tpu.memory_space<vmem>>, %arg9: memref<1x84xf32, #tpu.memory_space<vmem>>, %arg10: memref<84x128xbf16, #tpu.memory_space<vmem>>, %arg11: memref<1x128xf32, #tpu.memory_space<vmem>>, %arg12: memref<8x128xf32, #tpu.memory_space<vmem>>) attributes {dimension_semantics = [#tpu.dimension_semantics<parallel>], iteration_bounds = array<i64: 1>, scalar_prefetch = 0 : i64, scratch_operands = 0 : i64, tpu.core_type = #tpu.core_type<tc>, window_params = [{transform_indices = @transform_0, window_bounds = array<i64: 24, 8, 140>}, {pipeline_mode = #tpu.pipeline_mode<synchronous>, transform_indices = @transform_1, window_bounds = array<i64: 140, 256>}, {pipeline_mode = #tpu.pipeline_mode<synchronous>, transform_indices = @transform_2, window_bounds = array<i64: 1, 128>}, {pipeline_mode = #tpu.pipeline_mode<synchronous>, transform_indices = @transform_3, window_bounds = array<i64: 640, 256>}, {pipeline_mode = #tpu.pipeline_mode<synchronous>, transform_indices = @transform_4, window_bounds = array<i64: 1, 128>}, {pipeline_mode = #tpu.pipeline_mode<synchronous>, transform_indices = @transform_5, window_bounds = array<i64: 512, 120>}, {pipeline_mode = #tpu.pipeline_mode<synchronous>, transform_indices = @transform_6, window_bounds = array<i64: 1, 120>}, {pipeline_mode = #tpu.pipeline_mode<synchronous>, transform_indices = @transform_7, window_bounds = array<i64: 120, 84>}, {pipeline_mode = #tpu.pipeline_mode<synchronous>, transform_indices = @transform_8, window_bounds = array<i64: 1, 84>}, {pipeline_mode = #tpu.pipeline_mode<synchronous>, transform_indices = @transform_9, window_bounds = array<i64: 84, 128>}, {pipeline_mode = #tpu.pipeline_mode<synchronous>, transform_indices = @transform_10, window_bounds = array<i64: 1, 128>}, {transform_indices = @transform_11, window_bounds = array<i64: 8, 128>}]} {
    %c0 = arith.constant 0 : index
    %c0_0 = arith.constant 0 : index
    %c0_1 = arith.constant 0 : index
    %0 = vector.load %arg1[%c0, %c0_0, %c0_1] : memref<24x8x140xf32, #tpu.memory_space<vmem>>, vector<24x8x140xf32>
    %1 = vector.shape_cast %0 : vector<24x8x140xf32> to vector<192x140xf32>
    %2 = arith.truncf %1 : vector<192x140xf32> to vector<192x140xbf16>
    %c0_2 = arith.constant 0 : index
    %c0_3 = arith.constant 0 : index
    %3 = vector.load %arg2[%c0_2, %c0_3] : memref<140x256xbf16, #tpu.memory_space<vmem>>, vector<140x256xbf16>
    %cst = arith.constant dense<0.000000e+00> : vector<192x256xf32>
    %4 = tpu.matmul %2, %3, %cst {dimension_numbers = #tpu.dot_dimension_numbers<[1], [0], [0], [1], [0, 0, 1, 1], [], []>} : vector<192x140xbf16>, vector<140x256xbf16>, vector<192x256xf32> -> vector<192x256xf32>
    %5 = vector.shape_cast %4 : vector<192x256xf32> to vector<12x2x8x256xf32>
    %6 = vector.extract_strided_slice %5 {offsets = [0, 0, 0, 0], sizes = [12, 1, 8, 256], strides = [1, 1, 1, 1]} : vector<12x2x8x256xf32> to vector<12x1x8x256xf32>
    %7 = vector.shape_cast %6 : vector<12x1x8x256xf32> to vector<12x8x256xf32>
    %8 = vector.extract_strided_slice %5 {offsets = [0, 1, 0, 0], sizes = [12, 1, 8, 256], strides = [1, 1, 1, 1]} : vector<12x2x8x256xf32> to vector<12x1x8x256xf32>
    %9 = vector.shape_cast %8 : vector<12x1x8x256xf32> to vector<12x8x256xf32>
    %10 = arith.maximumf %7, %9 : vector<12x8x256xf32>
    %11 = vector.shape_cast %10 : vector<12x8x256xf32> to vector<96x256xf32>
    %12 = vector.extract_strided_slice %11 {offsets = [0, 0], sizes = [96, 128], strides = [1, 1]} : vector<96x256xf32> to vector<96x128xf32>
    %13 = vector.extract_strided_slice %11 {offsets = [0, 128], sizes = [96, 128], strides = [1, 1]} : vector<96x256xf32> to vector<96x128xf32>
    %14 = arith.maximumf %12, %13 : vector<96x128xf32>
    %c0_4 = arith.constant 0 : index
    %c0_5 = arith.constant 0 : index
    %15 = vector.load %arg3[%c0_4, %c0_5] : memref<1x128xf32, #tpu.memory_space<vmem>>, vector<1x128xf32>
    %16 = vector.broadcast %15 : vector<1x128xf32> to vector<96x128xf32>
    %17 = arith.addf %14, %16 : vector<96x128xf32>
    %cst_6 = arith.constant 0.000000e+00 : f32
    %18 = vector.broadcast %cst_6 : f32 to vector<96x128xf32>
    %19 = arith.maximumf %17, %18 : vector<96x128xf32>
    %20 = vector.shape_cast %19 : vector<96x128xf32> to vector<12x8x128xf32>
    %21 = vector.extract_strided_slice %20 {offsets = [0, 0, 0], sizes = [8, 8, 128], strides = [1, 1, 1]} : vector<12x8x128xf32> to vector<8x8x128xf32>
    %22 = vector.shape_cast %21 : vector<8x8x128xf32> to vector<64x128xf32>
    %23 = vector.extract_strided_slice %20 {offsets = [1, 0, 0], sizes = [8, 8, 128], strides = [1, 1, 1]} : vector<12x8x128xf32> to vector<8x8x128xf32>
    %24 = vector.shape_cast %23 : vector<8x8x128xf32> to vector<64x128xf32>
    %25 = vector.extract_strided_slice %20 {offsets = [2, 0, 0], sizes = [8, 8, 128], strides = [1, 1, 1]} : vector<12x8x128xf32> to vector<8x8x128xf32>
    %26 = vector.shape_cast %25 : vector<8x8x128xf32> to vector<64x128xf32>
    %27 = vector.extract_strided_slice %20 {offsets = [3, 0, 0], sizes = [8, 8, 128], strides = [1, 1, 1]} : vector<12x8x128xf32> to vector<8x8x128xf32>
    %28 = vector.shape_cast %27 : vector<8x8x128xf32> to vector<64x128xf32>
    %29 = vector.extract_strided_slice %20 {offsets = [4, 0, 0], sizes = [8, 8, 128], strides = [1, 1, 1]} : vector<12x8x128xf32> to vector<8x8x128xf32>
    %30 = vector.shape_cast %29 : vector<8x8x128xf32> to vector<64x128xf32>
    %31 = tpu.concatenate %22, %24, %26, %28, %30 in 1 : vector<64x128xf32>, vector<64x128xf32>, vector<64x128xf32>, vector<64x128xf32>, vector<64x128xf32> -> vector<64x640xf32>
    %32 = arith.truncf %31 : vector<64x640xf32> to vector<64x640xbf16>
    %c0_7 = arith.constant 0 : index
    %c0_8 = arith.constant 0 : index
    %33 = vector.load %arg4[%c0_7, %c0_8] : memref<640x256xbf16, #tpu.memory_space<vmem>>, vector<640x256xbf16>
    %cst_9 = arith.constant dense<0.000000e+00> : vector<64x256xf32>
    %34 = tpu.matmul %32, %33, %cst_9 {dimension_numbers = #tpu.dot_dimension_numbers<[1], [0], [0], [1], [0, 0, 1, 1], [], []>} : vector<64x640xbf16>, vector<640x256xbf16>, vector<64x256xf32> -> vector<64x256xf32>
    %35 = vector.shape_cast %34 : vector<64x256xf32> to vector<4x2x8x256xf32>
    %36 = vector.extract_strided_slice %35 {offsets = [0, 0, 0, 0], sizes = [4, 1, 8, 256], strides = [1, 1, 1, 1]} : vector<4x2x8x256xf32> to vector<4x1x8x256xf32>
    %37 = vector.shape_cast %36 : vector<4x1x8x256xf32> to vector<4x8x256xf32>
    %38 = vector.extract_strided_slice %35 {offsets = [0, 1, 0, 0], sizes = [4, 1, 8, 256], strides = [1, 1, 1, 1]} : vector<4x2x8x256xf32> to vector<4x1x8x256xf32>
    %39 = vector.shape_cast %38 : vector<4x1x8x256xf32> to vector<4x8x256xf32>
    %40 = arith.maximumf %37, %39 : vector<4x8x256xf32>
    %41 = vector.shape_cast %40 : vector<4x8x256xf32> to vector<32x256xf32>
    %42 = vector.extract_strided_slice %41 {offsets = [0, 0], sizes = [32, 128], strides = [1, 1]} : vector<32x256xf32> to vector<32x128xf32>
    %43 = vector.extract_strided_slice %41 {offsets = [0, 128], sizes = [32, 128], strides = [1, 1]} : vector<32x256xf32> to vector<32x128xf32>
    %44 = arith.maximumf %42, %43 : vector<32x128xf32>
    %c0_10 = arith.constant 0 : index
    %c0_11 = arith.constant 0 : index
    %45 = vector.load %arg5[%c0_10, %c0_11] : memref<1x128xf32, #tpu.memory_space<vmem>>, vector<1x128xf32>
    %46 = vector.broadcast %45 : vector<1x128xf32> to vector<32x128xf32>
    %47 = arith.addf %44, %46 : vector<32x128xf32>
    %cst_12 = arith.constant 0.000000e+00 : f32
    %48 = vector.broadcast %cst_12 : f32 to vector<32x128xf32>
    %49 = arith.maximumf %47, %48 : vector<32x128xf32>
    %50 = vector.shape_cast %49 : vector<32x128xf32> to vector<4x8x128xf32>
    %51 = vector.extract_strided_slice %50 {offsets = [0, 0, 0], sizes = [1, 8, 128], strides = [1, 1, 1]} : vector<4x8x128xf32> to vector<1x8x128xf32>
    %52 = vector.shape_cast %51 : vector<1x8x128xf32> to vector<8x128xf32>
    %53 = vector.extract_strided_slice %50 {offsets = [1, 0, 0], sizes = [1, 8, 128], strides = [1, 1, 1]} : vector<4x8x128xf32> to vector<1x8x128xf32>
    %54 = vector.shape_cast %53 : vector<1x8x128xf32> to vector<8x128xf32>
    %55 = vector.extract_strided_slice %50 {offsets = [2, 0, 0], sizes = [1, 8, 128], strides = [1, 1, 1]} : vector<4x8x128xf32> to vector<1x8x128xf32>
    %56 = vector.shape_cast %55 : vector<1x8x128xf32> to vector<8x128xf32>
    %57 = vector.extract_strided_slice %50 {offsets = [3, 0, 0], sizes = [1, 8, 128], strides = [1, 1, 1]} : vector<4x8x128xf32> to vector<1x8x128xf32>
    %58 = vector.shape_cast %57 : vector<1x8x128xf32> to vector<8x128xf32>
    %59 = tpu.concatenate %52, %54, %56, %58 in 1 : vector<8x128xf32>, vector<8x128xf32>, vector<8x128xf32>, vector<8x128xf32> -> vector<8x512xf32>
    %60 = arith.truncf %59 : vector<8x512xf32> to vector<8x512xbf16>
    %c0_13 = arith.constant 0 : index
    %c0_14 = arith.constant 0 : index
    %61 = vector.load %arg6[%c0_13, %c0_14] : memref<512x120xbf16, #tpu.memory_space<vmem>>, vector<512x120xbf16>
    %cst_15 = arith.constant dense<0.000000e+00> : vector<8x120xf32>
    %62 = tpu.matmul %60, %61, %cst_15 {dimension_numbers = #tpu.dot_dimension_numbers<[1], [0], [0], [1], [0, 0, 1, 1], [], []>} : vector<8x512xbf16>, vector<512x120xbf16>, vector<8x120xf32> -> vector<8x120xf32>
    %c0_16 = arith.constant 0 : index
    %c0_17 = arith.constant 0 : index
    %63 = vector.load %arg7[%c0_16, %c0_17] : memref<1x120xf32, #tpu.memory_space<vmem>>, vector<1x120xf32>
    %64 = vector.broadcast %63 : vector<1x120xf32> to vector<8x120xf32>
    %65 = arith.addf %62, %64 : vector<8x120xf32>
    %cst_18 = arith.constant 0.000000e+00 : f32
    %66 = vector.broadcast %cst_18 : f32 to vector<8x120xf32>
    %67 = arith.maximumf %65, %66 : vector<8x120xf32>
    %68 = arith.truncf %67 : vector<8x120xf32> to vector<8x120xbf16>
    %c0_19 = arith.constant 0 : index
    %c0_20 = arith.constant 0 : index
    %69 = vector.load %arg8[%c0_19, %c0_20] : memref<120x84xbf16, #tpu.memory_space<vmem>>, vector<120x84xbf16>
    %cst_21 = arith.constant dense<0.000000e+00> : vector<8x84xf32>
    %70 = tpu.matmul %68, %69, %cst_21 {dimension_numbers = #tpu.dot_dimension_numbers<[1], [0], [0], [1], [0, 0, 1, 1], [], []>} : vector<8x120xbf16>, vector<120x84xbf16>, vector<8x84xf32> -> vector<8x84xf32>
    %c0_22 = arith.constant 0 : index
    %c0_23 = arith.constant 0 : index
    %71 = vector.load %arg9[%c0_22, %c0_23] : memref<1x84xf32, #tpu.memory_space<vmem>>, vector<1x84xf32>
    %72 = vector.broadcast %71 : vector<1x84xf32> to vector<8x84xf32>
    %73 = arith.addf %70, %72 : vector<8x84xf32>
    %cst_24 = arith.constant 0.000000e+00 : f32
    %74 = vector.broadcast %cst_24 : f32 to vector<8x84xf32>
    %75 = arith.maximumf %73, %74 : vector<8x84xf32>
    %76 = arith.truncf %75 : vector<8x84xf32> to vector<8x84xbf16>
    %c0_25 = arith.constant 0 : index
    %c0_26 = arith.constant 0 : index
    %77 = vector.load %arg10[%c0_25, %c0_26] : memref<84x128xbf16, #tpu.memory_space<vmem>>, vector<84x128xbf16>
    %cst_27 = arith.constant dense<0.000000e+00> : vector<8x128xf32>
    %78 = tpu.matmul %76, %77, %cst_27 {dimension_numbers = #tpu.dot_dimension_numbers<[1], [0], [0], [1], [0, 0, 1, 1], [], []>} : vector<8x84xbf16>, vector<84x128xbf16>, vector<8x128xf32> -> vector<8x128xf32>
    %c0_28 = arith.constant 0 : index
    %c0_29 = arith.constant 0 : index
    %79 = vector.load %arg11[%c0_28, %c0_29] : memref<1x128xf32, #tpu.memory_space<vmem>>, vector<1x128xf32>
    %80 = vector.broadcast %79 : vector<1x128xf32> to vector<8x128xf32>
    %81 = arith.addf %78, %80 : vector<8x128xf32>
    %c0_30 = arith.constant 0 : index
    %c0_31 = arith.constant 0 : index
    %82 = vector.load %arg12[%c0_30, %c0_31] : memref<8x128xf32, #tpu.memory_space<vmem>>, vector<8x128xf32>
    tpu.vector_store %arg12[%c0_30, %c0_31], %81 {strides = array<i32>} : memref<8x128xf32, #tpu.memory_space<vmem>>, vector<8x128xf32>,
    return
  }
  func.func @transform_0(%arg0: i32) -> (i32, i32, i32) {
    %c0_i32 = arith.constant 0 : i32
    %c0_i32_0 = arith.constant 0 : i32
    %c0_i32_1 = arith.constant 0 : i32
    return %c0_i32, %arg0, %c0_i32_0 : i32, i32, i32
  }
  func.func @transform_1(%arg0: i32) -> (i32, i32) {
    %c0_i32 = arith.constant 0 : i32
    %c0_i32_0 = arith.constant 0 : i32
    %c0_i32_1 = arith.constant 0 : i32
    return %c0_i32, %c0_i32_0 : i32, i32
  }
  func.func @transform_2(%arg0: i32) -> (i32, i32) {
    %c0_i32 = arith.constant 0 : i32
    %c0_i32_0 = arith.constant 0 : i32
    %c0_i32_1 = arith.constant 0 : i32
    return %c0_i32, %c0_i32_0 : i32, i32
  }
  func.func @transform_3(%arg0: i32) -> (i32, i32) {
    %c0_i32 = arith.constant 0 : i32
    %c0_i32_0 = arith.constant 0 : i32
    %c0_i32_1 = arith.constant 0 : i32
    return %c0_i32, %c0_i32_0 : i32, i32
  }
  func.func @transform_4(%arg0: i32) -> (i32, i32) {
    %c0_i32 = arith.constant 0 : i32
    %c0_i32_0 = arith.constant 0 : i32
    %c0_i32_1 = arith.constant 0 : i32
    return %c0_i32, %c0_i32_0 : i32, i32
  }
  func.func @transform_5(%arg0: i32) -> (i32, i32) {
    %c0_i32 = arith.constant 0 : i32
    %c0_i32_0 = arith.constant 0 : i32
    %c0_i32_1 = arith.constant 0 : i32
    return %c0_i32, %c0_i32_0 : i32, i32
  }
  func.func @transform_6(%arg0: i32) -> (i32, i32) {
    %c0_i32 = arith.constant 0 : i32
    %c0_i32_0 = arith.constant 0 : i32
    %c0_i32_1 = arith.constant 0 : i32
    return %c0_i32, %c0_i32_0 : i32, i32
  }
  func.func @transform_7(%arg0: i32) -> (i32, i32) {
    %c0_i32 = arith.constant 0 : i32
    %c0_i32_0 = arith.constant 0 : i32
    %c0_i32_1 = arith.constant 0 : i32
    return %c0_i32, %c0_i32_0 : i32, i32
  }
  func.func @transform_8(%arg0: i32) -> (i32, i32) {
    %c0_i32 = arith.constant 0 : i32
    %c0_i32_0 = arith.constant 0 : i32
    %c0_i32_1 = arith.constant 0 : i32
    return %c0_i32, %c0_i32_0 : i32, i32
  }
  func.func @transform_9(%arg0: i32) -> (i32, i32) {
    %c0_i32 = arith.constant 0 : i32
    %c0_i32_0 = arith.constant 0 : i32
    %c0_i32_1 = arith.constant 0 : i32
    return %c0_i32, %c0_i32_0 : i32, i32
  }
  func.func @transform_10(%arg0: i32) -> (i32, i32) {
    %c0_i32 = arith.constant 0 : i32
    %c0_i32_0 = arith.constant 0 : i32
    %c0_i32_1 = arith.constant 0 : i32
    return %c0_i32, %c0_i32_0 : i32, i32
  }
  func.func @transform_11(%arg0: i32) -> (i32, i32) {
    %c0_i32 = arith.constant 0 : i32
    %c0_i32_0 = arith.constant 0 : i32
    return %arg0, %c0_i32 : i32, i32
  }
}

</mosaic_0001>

<bundles_post_ra>
// kernel: tile.48
= control target key start
LH: loop header
LB: loop body
LE: loop exit
PB: predicated region body
PF: predicated region fallthrough
CT: control target
= control target key end

     0   :  { %s22_s0 = inlined_call_operand.vmem [shape: f32[16], index: 0, kind: input, shape index: {}]   ;;  %s23_s1 = inlined_call_operand.vmem [shape: f32[4,16], index: 1, kind: output, shape index: {}]  }
   0x1   :  { %v4_v0 = vld [vmem:[%s22_s0] ss:$0 sm:$0xff] }
   0x2   :  { %5 = vst [vmem:[%s23_s1] sm:$0xf] %v4_v0 }

// kernel: tile.49
= control target key start
LH: loop header
LB: loop body
LE: loop exit
PB: predicated region body
PF: predicated region fallthrough
CT: control target
= control target key end

     0   :  { %s37_s8 = smov 16   ;;  %s38_s9 = smov 32   ;;  %vm7_vm0 = vcmask 130048   ;;  %vm13_vm1 = vcmask 523648   ;;  %vm19_vm2 = vcmask 392448   ;;  %vm25_vm3 = vcmask 261248   ;;  %s55_s0 = inlined_call_operand.vmem [shape: f32[4,16], index: 0, kind: input, shape index: {}]   ;;  %s56_s1 = inlined_call_operand.vmem [shape: f32[64], index: 1, kind: output, shape index: {}]  }
   0x1   :  { %v4_v0 = vld [vmem:[%s55_s0] sm:$0xf]  ;;  %s36_s0 = smov 48  }
   0x2   :  { %5 = vst [vmem:[#allocation1] sm:$0xf] %v4_v0 }
   0x9   :  { %v10_v1 = vld [vmem:[#allocation1 + $0x3] sm:$0x1]   ;;  %v22_v2 = vld [vmem:[#allocation1 + $0x1] sm:$0x1]   ;;  %v16_v3 = vld [vmem:[#allocation1 + $0x2] sm:$0x1]  }
   0xa   :  { %11 = vrot.lane.b32.xlu0 %v10_v1, %s36_s0  ;;  %23 = vrot.lane.b32.xlu1 %v22_v2, %s37_s8  ;;  %v6_v4 = vld [vmem:[#allocation1] sm:$0x1]  }
   0xb   :  { %8 = vst.msk [vmem:[#allocation0] sm:$0x1] %vm7_vm0, %v6_v4  }
  0x12   :  { %17 = vrot.lane.b32.xlu0 %v16_v3, %s38_s9 }
  0x7c   :  { %v12_v5 = vpop.permute.xlu0 %11   ;;  %v24_v6 = vpop.permute.xlu1 %23  }
  0x7d   :  { %14 = vst.msk [vmem:[#allocation0] sm:$0x1] %vm13_vm1, %v12_v5  }
  0x84   :  { %v18_v7 = vpop.permute.xlu0 %17  }
  0x85   :  { %20 = vst.msk [vmem:[#allocation0] sm:$0x1] %vm19_vm2, %v18_v7  }
  0x86   :  { %26 = vst.msk [vmem:[#allocation0] sm:$0x1] %vm25_vm3, %v24_v6  }
  0x8d   :  { %v29_v8 = vld [vmem:[#allocation0] sm:$0x1] }
  0x8e   :  { %32 = vst [vmem:[%s56_s1] sm:$0x1] %v29_v8 }

// kernel: tile.33
= control target key start
LH: loop header
LB: loop body
LE: loop exit
PB: predicated region body
PF: predicated region fallthrough
CT: control target
= control target key end

     0   :  { %s28_s0 = inlined_call_operand.vmem [shape: f32[6], index: 0, kind: input, shape index: {}]   ;;  %s29_s1 = inlined_call_operand.vmem [shape: f32[12,6], index: 1, kind: output, shape index: {}]  }
   0x1   :  { %v4_v0 = vld [vmem:[%s28_s0] ss:$0 sm:$0xff] }
   0x2   :  { %5 = vst [vmem:[%s29_s1] sm:$0xff] %v4_v0 }
   0x3   :  { %8 = vst [vmem:[%s29_s1 + $0x8] sm:$0xff] %v4_v0 }

// kernel: tile.34
= control target key start
LH: loop header
LB: loop body
LE: loop exit
PB: predicated region body
PF: predicated region fallthrough
CT: control target
= control target key end

     0   :  { %s99_s10 = smov 66   ;;  %s100_s11 = smov 54   ;;  %vm3_vm0 = vcmask 48128   ;;  %vm9_vm1 = vcmask 589328   ;;  %vm15_vm2 = vcmask 540128   ;;  %vm21_vm3 = vcmask 490928   ;;  %s159_s0 = inlined_call_operand.vmem [shape: f32[12,6], index: 0, kind: input, shape index: {}]   ;;  %s160_s1 = inlined_call_operand.vmem [shape: f32[72], index: 1, kind: output, shape index: {}]  }
   0x1   :  { %v77_v0 = vld [vmem:[%s159_s0 + $0xb] sm:$0x1]   ;;  %v79_v1 = vld [vmem:[%s159_s0 + $0x9] sm:$0x1]   ;;  %v81_v2 = vld [vmem:[%s159_s0 + $0x7] sm:$0x1]  }
   0x2   :  { %7 = vrot.lane.b32.xlu0 %v77_v0, %s99_s10  ;;  %19 = vrot.lane.b32.xlu1 %v79_v1, %s100_s11  ;;  %s101_s14 = smov 42   ;;  %v78_v3 = vld [vmem:[%s159_s0 + $0xa] sm:$0x1]   ;;  %v80_v4 = vld [vmem:[%s159_s0 + $0x8] sm:$0x1]   ;;  %s102_s19 = smov 60  }
   0x3   :  { %31 = vrot.lane.b32.xlu2 %v81_v2, %s101_s14  ;;  %s103_s20 = smov 48   ;;  %v82_v5 = vld [vmem:[%s159_s0 + $0x6] sm:$0x1]   ;;  %s104_s23 = smov 36   ;;  %v83_v6 = vld [vmem:[%s159_s0 + $0x5] sm:$0x1]  }
   0x4   :  { %v84_v7 = vld [vmem:[%s159_s0 + $0x4] sm:$0x1]   ;;  %s105_s28 = smov 30   ;;  %s106_s29 = smov 24   ;;  %v85_v8 = vld [vmem:[%s159_s0 + $0x3] sm:$0x1]  }
   0x5   :  { %s107_s3 = smov 18   ;;  %v86_v9 = vld [vmem:[%s159_s0 + $0x2] sm:$0x1]   ;;  %v87_v10 = vld [vmem:[%s159_s0 + $0x1] sm:$0x1]   ;;  %s108_s8 = smov 12  }
   0x6   :  { %s109_s9 = smov 6   ;;  %v2_v11 = vld [vmem:[%s159_s0] sm:$0x1]   ;;  %vm27_vm4 = vcmask 441728   ;;  %vm33_vm5 = vcmask 392528   ;;  %vm39_vm6 = vcmask 343328  }
   0x7   :  { %4 = vst.msk [vmem:[#allocation0] sm:$0x1] %vm3_vm0, %v2_v11   ;;  %vm45_vm7 = vcmask 294128   ;;  %vm51_vm8 = vcmask 244928   ;;  %vm57_vm9 = vcmask 195728   ;;  %vm63_vm10 = vcmask 146528  }
   0x8   :  { %vm69_vm11 = vcmask 97328  }
   0xa   :  { %13 = vrot.lane.b32.xlu0 %v78_v3, %s102_s19  ;;  %25 = vrot.lane.b32.xlu1 %v80_v4, %s103_s20 }
   0xb   :  { %37 = vrot.lane.b32.xlu2 %v82_v5, %s104_s23 }
  0x12   :  { %43 = vrot.lane.b32.xlu0 %v83_v6, %s105_s28  ;;  %49 = vrot.lane.b32.xlu1 %v84_v7, %s106_s29 }
  0x13   :  { %55 = vrot.lane.b32.xlu2 %v85_v8, %s107_s3 }
  0x1a   :  { %61 = vrot.lane.b32.xlu0 %v86_v9, %s108_s8  ;;  %67 = vrot.lane.b32.xlu1 %v87_v10, %s109_s9 }
  0x5d   :  { %v32_v12 = vpop.permute.xlu2 %31  }
  0x65   :  { %v38_v13 = vpop.permute.xlu2 %37  }
  0x6d   :  { %v56_v14 = vpop.permute.xlu2 %55  }
  0x74   :  { %v8_v15 = vpop.permute.xlu0 %7   ;;  %v20_v16 = vpop.permute.xlu1 %19  }
  0x75   :  { %10 = vst.msk [vmem:[#allocation0] sm:$0x1] %vm9_vm1, %v8_v15  }
  0x7c   :  { %v14_v17 = vpop.permute.xlu0 %13   ;;  %v26_v18 = vpop.permute.xlu1 %25  }
  0x7d   :  { %16 = vst.msk [vmem:[#allocation0] sm:$0x1] %vm15_vm2, %v14_v17  }
  0x7e   :  { %22 = vst.msk [vmem:[#allocation0] sm:$0x1] %vm21_vm3, %v20_v16  }
  0x7f   :  { %28 = vst.msk [vmem:[#allocation0] sm:$0x1] %vm27_vm4, %v26_v18  }
  0x80   :  { %34 = vst.msk [vmem:[#allocation0] sm:$0x1] %vm33_vm5, %v32_v12  }
  0x81   :  { %40 = vst.msk [vmem:[#allocation0] sm:$0x1] %vm39_vm6, %v38_v13  }
  0x84   :  { %v44_v19 = vpop.permute.xlu0 %43   ;;  %v50_v20 = vpop.permute.xlu1 %49  }
  0x85   :  { %46 = vst.msk [vmem:[#allocation0] sm:$0x1] %vm45_vm7, %v44_v19  }
  0x86   :  { %52 = vst.msk [vmem:[#allocation0] sm:$0x1] %vm51_vm8, %v50_v20  }
  0x87   :  { %58 = vst.msk [vmem:[#allocation0] sm:$0x1] %vm57_vm9, %v56_v14  }
  0x8c   :  { %v62_v21 = vpop.permute.xlu0 %61   ;;  %v68_v22 = vpop.permute.xlu1 %67  }
  0x8d   :  { %64 = vst.msk [vmem:[#allocation0] sm:$0x1] %vm63_vm10, %v62_v21  }
  0x8e   :  { %70 = vst.msk [vmem:[#allocation0] sm:$0x1] %vm69_vm11, %v68_v22  }
  0x95   :  { %v73_v23 = vld [vmem:[#allocation0] sm:$0x1] }
  0x96   :  { %76 = vst [vmem:[%s160_s1] sm:$0x1] %v73_v23 }

// kernel: emnist_forward.1
= control target key start
LH: loop header
LB: loop body
LE: loop exit
PB: predicated region body
PF: predicated region fallthrough
CT: control target
= control target key end

     0   :  { %vm254_vm0 = vcmask 1045504   ;;  %vm217_vm1 = vcmask 97280   ;;  %vm1792_vm2 = vcmask 1043456   ;;  %vm1863_vm3 = vcmask 1041408   ;;  %s3835_s1 = inlined_call_operand.vmem [shape: bf16[140,256], index: 1, kind: input, shape index: {}]   ;;  %s3836_s0 = inlined_call_operand.vmem [shape: f32[24,8,140], index: 0, kind: input, shape index: {}]   ;;  %s3837_s3 = inlined_call_operand.vmem [shape: bf16[640,256], index: 3, kind: input, shape index: {}]   ;;  %s3838_s2 = inlined_call_operand.vmem [shape: f32[1,128], index: 2, kind: input, shape index: {}]   ;;  %s3839_s4 = inlined_call_operand.vmem [shape: f32[1,128], index: 4, kind: input, shape index: {}]   ;;  %s3840_s6 = inlined_call_operand.vmem [shape: f32[1,120], index: 6, kind: input, shape index: {}]   ;;  %s3841_s5 = inlined_call_operand.vmem [shape: bf16[512,120], index: 5, kind: input, shape index: {}]   ;;  %s3842_s7 = inlined_call_operand.vmem [shape: bf16[120,84], index: 7, kind: input, shape index: {}]   ;;  %s3843_s8 = inlined_call_operand.vmem [shape: f32[1,84], index: 8, kind: input, shape index: {}]   ;;  %s3844_s9 = inlined_call_operand.vmem [shape: bf16[84,128], index: 9, kind: input, shape index: {}]   ;;  %s3845_s10 = inlined_call_operand.vmem [shape: f32[1,128], index: 10, kind: input, shape index: {}]   ;;  %s3846_s11 = inlined_call_operand.vmem [shape: f32[8,128], index: 11, kind: output, shape index: {}]  }
   0x1   :  { %v1943_v0 = vld [vmem:[%s3835_s1 + $0x70] sm:$0xf]  ;;  %v2494_v1 = vld [vmem:[%s3835_s1 + $0x74] sm:$0xf0]  ;;  %v2493_v2 = vld [vmem:[%s3835_s1 + $0x74] sm:$0xf] }
   0x2   :  { %v1944_v3 = vor.u32 %v2494_v1, %v1943_v0  ;;  %v1945_v4 = vld [vmem:[%s3835_s1 + $0x78] sm:$0xf0]  ;;  %v1935_v5 = vld [vmem:[%s3835_s1 + $0x60] sm:$0xf]  ;;  %v2492_v6 = vld [vmem:[%s3835_s1 + $0x64] sm:$0xf0] }
   0x3   :  { %v1948_v7 = vor.u32 %v2493_v2, %v1945_v4  ;;  %v1951_v8 = vld [vmem:[%s3835_s1 + $0x80] sm:$0xf]  ;;  %v2496_v9 = vld [vmem:[%s3835_s1 + $0x84] sm:$0x30]  ;;  %v2491_v10 = vld [vmem:[%s3835_s1 + $0x64] sm:$0xf]  ;;  %v1936_v11 = vor.u32 %v2492_v6, %v1935_v5 }
   0x4   :  { %261 = vmatpush.bf16.msra.mxu0 %v1944_v3  ;;  %v1952_v12 = vor.u32 %v2496_v9, %v1951_v8  ;;  %v1937_v13 = vld [vmem:[%s3835_s1 + $0x68] sm:$0xf0]  ;;  %v42_v15 = vld [vmem:[%s3836_s0 + $0x18] sm:$0xff]  ;;  %v1927_v17 = vld [vmem:[%s3835_s1 + $0x50] sm:$0xf]  ;;  %vm1788_vm4 = vcmask 982016  }
   0x5   :  { %v40_v14 = vld [vmem:[%s3836_s0 + $0x8] sm:$0xff]  ;;  %399 = vmatpush.bf16.msra.mxu2 %v1948_v7  ;;  %v1940_v16 = vor.u32 %v2491_v10, %v1937_v13  ;;  %v2490_v18 = vld [vmem:[%s3835_s1 + $0x54] sm:$0xf0]  ;;  %v2489_v21 = vld [vmem:[%s3835_s1 + $0x54] sm:$0xf]  ;;  %vm1859_vm5 = vcmask 687104  }
   0x6   :  { %v256_v19 = vsel %vm254_vm0, %v1952_v12, 0  ;;  %v88_v20 = vpack.c.bf16 %v42_v15, %v40_v14  ;;  %v1929_v22 = vld [vmem:[%s3835_s1 + $0x58] sm:$0xf0]  ;;  %v1928_v23 = vor.u32 %v2490_v18, %v1927_v17  ;;  %v1919_v25 = vld [vmem:[%s3835_s1 + $0x40] sm:$0xf]  ;;  %v44_v45 = vld [vmem:[%s3836_s0 + $0x28] sm:$0xff] }
   0x7   :  { %337 = vmatpush.bf16.msra.mxu1 %v256_v19  ;;  %v1932_v24 = vor.u32 %v2489_v21, %v1929_v22  ;;  %v2488_v26 = vld [vmem:[%s3835_s1 + $0x44] sm:$0xf0]  ;;  %v2487_v27 = vld [vmem:[%s3835_s1 + $0x44] sm:$0xf]  ;;  %v1921_v28 = vld [vmem:[%s3835_s1 + $0x48] sm:$0xf0] }
   0x8   :  { %262 = vmatpush.bf16.msra.mxu0 %v1936_v11  ;;  %v2495_v29 = vld [vmem:[%s3835_s1 + $0x84] sm:$0xf]  ;;  %v1953_v30 = vld [vmem:[%s3835_s1 + $0x88] sm:$0x30]  ;;  %v1920_v31 = vor.u32 %v2488_v26, %v1919_v25  ;;  %v1924_v33 = vor.u32 %v2487_v27, %v1921_v28  ;;  %v1911_v34 = vld [vmem:[%s3835_s1 + $0x30] sm:$0xf] }
   0x9   :  { %400 = vmatpush.bf16.msra.mxu2 %v1940_v16  ;;  %v1956_v32 = vor.u32 %v2495_v29, %v1953_v30  ;;  %v2486_v35 = vld [vmem:[%s3835_s1 + $0x34] sm:$0xf0]  ;;  %v2485_v36 = vld [vmem:[%s3835_s1 + $0x34] sm:$0xf]  ;;  %v1913_v37 = vld [vmem:[%s3835_s1 + $0x38] sm:$0xf0] }
   0xa   :  { %1957 = vmatmul.msk.bf16.vlgmr.msra.gmra.mxu1 %vm217_vm1, %v88_v20  ;;  %v1912_v39 = vor.u32 %v2486_v35, %v1911_v34  ;;  %v1916_v40 = vor.u32 %v2485_v36, %v1913_v37  ;;  %v1903_v41 = vld [vmem:[%s3835_s1 + $0x20] sm:$0xf]  ;;  %v2484_v42 = vld [vmem:[%s3835_s1 + $0x24] sm:$0xf0]  ;;  %v2483_v43 = vld [vmem:[%s3835_s1 + $0x24] sm:$0xf] }
   0xb   :  { %v259_v38 = vsel %vm254_vm0, %v1956_v32, 0  ;;  %v1905_v44 = vld [vmem:[%s3835_s1 + $0x28] sm:$0xf0]  ;;  %v46_v46 = vld [vmem:[%s3836_s0 + $0x38] sm:$0xff]  ;;  %v1904_v47 = vor.u32 %v2484_v42, %v1903_v41  ;;  %v1895_v49 = vld [vmem:[%s3835_s1 + $0x10] sm:$0xf] }
   0xc   :  { %263 = vmatpush.bf16.msra.mxu0 %v1928_v23  ;;  %475 = vmatpush.bf16.msra.mxu3 %v259_v38  ;;  %v1908_v48 = vor.u32 %v2483_v43, %v1905_v44  ;;  %v2482_v50 = vld [vmem:[%s3835_s1 + $0x14] sm:$0xf0]  ;;  %v90_v51 = vpack.c.bf16 %v46_v46, %v44_v45  ;;  %v2481_v52 = vld [vmem:[%s3835_s1 + $0x14] sm:$0xf]  ;;  %v1897_v53 = vld [vmem:[%s3835_s1 + $0x18] sm:$0xf0] }
   0xd   :  { %401 = vmatpush.bf16.msra.mxu2 %v1932_v24  ;;  %v1896_v54 = vor.u32 %v2482_v50, %v1895_v49  ;;  %v1900_v55 = vor.u32 %v2481_v52, %v1897_v53  ;;  %v1887_v56 = vld [vmem:[%s3835_s1] sm:$0xf]  ;;  %v2480_v57 = vld [vmem:[%s3835_s1 + $0x4] sm:$0xf0]  ;;  %v2479_v58 = vld [vmem:[%s3835_s1 + $0x4] sm:$0xf] }
   0xe   :  { %v1889_v59 = vld [vmem:[%s3835_s1 + $0x8] sm:$0xf0]  ;;  %v1888_v60 = vor.u32 %v2480_v57, %v1887_v56  ;;  %v39_v61 = vld [vmem:[%s3836_s0] sm:$0xff]  ;;  %v41_v62 = vld [vmem:[%s3836_s0 + $0x10] sm:$0xff] }
   0xf   :  { %1969 = vmatmul.msk.bf16.vlgmr.msra.gmra.mxu3 %vm217_vm1, %v88_v20  ;;  %v1892_v63 = vor.u32 %v2479_v58, %v1889_v59  ;;  %v87_v0 = vpack.c.bf16 %v41_v62, %v39_v61  ;;  %v48_v1 = vld [vmem:[%s3836_s0 + $0x48] sm:$0xff]  ;;  %v50_v2 = vld [vmem:[%s3836_s0 + $0x58] sm:$0xff]  ;;  %v2103_v4 = vld [vmem:[%s3837_s3 + $0xf0] sm:$0xf] }
  0x10   :  { %264 = vmatpush.bf16.msra.mxu0 %v1920_v31  ;;  %v92_v3 = vpack.c.bf16 %v50_v2, %v48_v1  ;;  %v2528_v5 = vld [vmem:[%s3837_s3 + $0xf4] sm:$0xf0]  ;;  %v2039_v6 = vld [vmem:[%s3837_s3 + $0x70] sm:$0xf]  ;;  %v43_v9 = vld [vmem:[%s3836_s0 + $0x20] sm:$0xff] }
  0x11   :  { %402 = vmatpush.bf16.msra.mxu2 %v1924_v33  ;;  %v2104_v7 = vor.u32 %v2528_v5, %v2103_v4  ;;  %v2512_v8 = vld [vmem:[%s3837_s3 + $0x74] sm:$0xf0]  ;;  %v45_v10 = vld [vmem:[%s3836_s0 + $0x30] sm:$0xff]  ;;  %v52_v13 = vld [vmem:[%s3836_s0 + $0x68] sm:$0xff] }
  0x12   :  { %v2040_v11 = vor.u32 %v2512_v8, %v2039_v6  ;;  %v89_v12 = vpack.c.bf16 %v45_v10, %v43_v9  ;;  %v54_v14 = vld [vmem:[%s3836_s0 + $0x78] sm:$0xff]  ;;  %v47_v16 = vld [vmem:[%s3836_s0 + $0x40] sm:$0xff]  ;;  %v49_v17 = vld [vmem:[%s3836_s0 + $0x50] sm:$0xff] }
  0x13   :  { %1121 = vmatpush.bf16.msrb.mxu3 %v2104_v7  ;;  %v94_v15 = vpack.c.bf16 %v54_v14, %v52_v13  ;;  %v91_v18 = vpack.c.bf16 %v49_v17, %v47_v16  ;;  %v56_v19 = vld [vmem:[%s3836_s0 + $0x88] sm:$0xff]  ;;  %v58_v20 = vld [vmem:[%s3836_s0 + $0x98] sm:$0xff]  ;;  %v2095_v21 = vld [vmem:[%s3837_s3 + $0xe0] sm:$0xf] }
  0x14   :  { %265 = vmatpush.bf16.msra.mxu0 %v1912_v39  ;;  %1092 = vmatpush.bf16.msrb.mxu1 %v2040_v11  ;;  %v2526_v22 = vld [vmem:[%s3837_s3 + $0xe4] sm:$0xf0]  ;;  %v2031_v23 = vld [vmem:[%s3837_s3 + $0x60] sm:$0xf]  ;;  %v96_v26 = vpack.c.bf16 %v58_v20, %v56_v19  ;;  %v53_v29 = vld [vmem:[%s3836_s0 + $0x70] sm:$0xff] }
  0x15   :  { %403 = vmatpush.bf16.msra.mxu2 %v1916_v40  ;;  %v2096_v24 = vor.u32 %v2526_v22, %v2095_v21  ;;  %v2510_v25 = vld [vmem:[%s3837_s3 + $0x64] sm:$0xf0]  ;;  %v51_v28 = vld [vmem:[%s3836_s0 + $0x60] sm:$0xff]  ;;  %v62_v32 = vld [vmem:[%s3836_s0 + $0xb8] sm:$0xff] }
  0x16   :  { %v2032_v27 = vor.u32 %v2510_v25, %v2031_v23  ;;  %v93_v30 = vpack.c.bf16 %v53_v29, %v51_v28  ;;  %v60_v31 = vld [vmem:[%s3836_s0 + $0xa8] sm:$0xff]  ;;  %v2087_v34 = vld [vmem:[%s3837_s3 + $0xd0] sm:$0xf]  ;;  %v2524_v35 = vld [vmem:[%s3837_s3 + $0xd4] sm:$0xf0] }
  0x17   :  { %1122 = vmatpush.bf16.msrb.mxu3 %v2096_v24  ;;  %v98_v33 = vpack.c.bf16 %v62_v32, %v60_v31  ;;  %v2023_v36 = vld [vmem:[%s3837_s3 + $0x50] sm:$0xf]  ;;  %v2088_v37 = vor.u32 %v2524_v35, %v2087_v34  ;;  %v2508_v38 = vld [vmem:[%s3837_s3 + $0x54] sm:$0xf0]  ;;  %v55_v39 = vld [vmem:[%s3836_s0 + $0x80] sm:$0xff] }
  0x18   :  { %266 = vmatpush.bf16.msra.mxu0 %v1904_v47  ;;  %1093 = vmatpush.bf16.msrb.mxu1 %v2032_v27  ;;  %v57_v40 = vld [vmem:[%s3836_s0 + $0x90] sm:$0xff]  ;;  %v2024_v41 = vor.u32 %v2508_v38, %v2023_v36  ;;  %v64_v43 = vld [vmem:[%s3836_s0 + $0xc8] sm:$0xff]  ;;  %v66_v44 = vld [vmem:[%s3836_s0 + $0xd8] sm:$0xff] }
  0x19   :  { %404 = vmatpush.bf16.msra.mxu2 %v1908_v48  ;;  %v95_v42 = vpack.c.bf16 %v57_v40, %v55_v39  ;;  %v2231_v45 = vld [vmem:[%s3837_s3 + $0x1f0] sm:$0xf]  ;;  %v2560_v46 = vld [vmem:[%s3837_s3 + $0x1f4] sm:$0xf0]  ;;  %v100_v48 = vpack.c.bf16 %v66_v44, %v64_v43  ;;  %v59_v52 = vld [vmem:[%s3836_s0 + $0xa0] sm:$0xff] }
  0x1a   :  { %1958 = vmatmul.msk.bf16.gmra.mxu1 %vm217_vm1, %v90_v51  ;;  %v2232_v47 = vor.u32 %v2560_v46, %v2231_v45  ;;  %v2167_v49 = vld [vmem:[%s3837_s3 + $0x170] sm:$0xf]  ;;  %v2544_v50 = vld [vmem:[%s3837_s3 + $0x174] sm:$0xf0]  ;;  %v2079_v57 = vld [vmem:[%s3837_s3 + $0xc0] sm:$0xf] }
  0x1b   :  { %1123 = vmatpush.bf16.msrb.mxu3 %v2088_v37  ;;  %v61_v53 = vld [vmem:[%s3836_s0 + $0xb0] sm:$0xff]  ;;  %v70_v56 = vld [vmem:[%s3836_s0 + $0xf8] sm:$0xff]  ;;  %v2522_v58 = vld [vmem:[%s3837_s3 + $0xc4] sm:$0xf0] }
  0x1c   :  { %267 = vmatpush.bf16.msra.mxu0 %v1896_v54  ;;  %1094 = vmatpush.bf16.msrb.mxu1 %v2024_v41  ;;  %v97_v54 = vpack.c.bf16 %v61_v53, %v59_v52  ;;  %v2015_v59 = vld [vmem:[%s3837_s3 + $0x40] sm:$0xf]  ;;  %v2506_v61 = vld [vmem:[%s3837_s3 + $0x44] sm:$0xf0]  ;;  %v65_v4 = vld [vmem:[%s3836_s0 + $0xd0] sm:$0xff] }
  0x1d   :  { %405 = vmatpush.bf16.msra.mxu2 %v1900_v55  ;;  %v68_v55 = vld [vmem:[%s3836_s0 + $0xe8] sm:$0xff]  ;;  %v74_v7 = vld [vmem:[%s3836_s0 + $0x118] sm:$0xff]  ;;  %v2159_v8 = vld [vmem:[%s3837_s3 + $0x160] sm:$0xf] }
  0x1e   :  { %v102_v62 = vpack.c.bf16 %v70_v56, %v68_v55  ;;  %v2558_v1 = vld [vmem:[%s3837_s3 + $0x1e4] sm:$0xf0]  ;;  %v2071_v13 = vld [vmem:[%s3837_s3 + $0xb0] sm:$0xf]  ;;  %v2520_v14 = vld [vmem:[%s3837_s3 + $0xb4] sm:$0xf0] }
  0x1f   :  { %1970 = vmatmul.msk.bf16.gmra.mxu3 %vm217_vm1, %v90_v51  ;;  %v2168_v51 = vor.u32 %v2544_v50, %v2167_v49  ;;  %v72_v6 = vld [vmem:[%s3836_s0 + $0x108] sm:$0xff]  ;;  %v69_v16 = vld [vmem:[%s3836_s0 + $0xf0] sm:$0xff]  ;;  %v2072_v17 = vor.u32 %v2520_v14, %v2071_v13  ;;  %v78_v21 = vld [vmem:[%s3836_s0 + $0x138] sm:$0xff] }
  0x20   :  { %268 = vmatpush.bf16.msra.mxu0 %v1888_v60  ;;  %v2080_v60 = vor.u32 %v2522_v58, %v2079_v57  ;;  %v2542_v9 = vld [vmem:[%s3837_s3 + $0x164] sm:$0xf0]  ;;  %v104_v11 = vpack.c.bf16 %v74_v7, %v72_v6  ;;  %v2007_v25 = vld [vmem:[%s3837_s3 + $0x30] sm:$0xf]  ;;  %v2556_v29 = vld [vmem:[%s3837_s3 + $0x1d4] sm:$0xf0] }
  0x21   :  { %406 = vmatpush.bf16.msra.mxu2 %v1892_v63  ;;  %v2016_v63 = vor.u32 %v2506_v61, %v2015_v59  ;;  %v2160_v10 = vor.u32 %v2542_v9, %v2159_v8  ;;  %v76_v20 = vld [vmem:[%s3836_s0 + $0x128] sm:$0xff]  ;;  %v2215_v27 = vld [vmem:[%s3837_s3 + $0x1d0] sm:$0xf]  ;;  %v2540_v32 = vld [vmem:[%s3837_s3 + $0x154] sm:$0xf0] }
  0x22   :  { %1124 = vmatpush.bf16.msrb.mxu3 %v2080_v60  ;;  %v106_v23 = vpack.c.bf16 %v78_v21, %v76_v20  ;;  %v2151_v31 = vld [vmem:[%s3837_s3 + $0x150] sm:$0xf]  ;;  %v1999_v37 = vld [vmem:[%s3837_s3 + $0x20] sm:$0xf]  ;;  %v2502_v38 = vld [vmem:[%s3837_s3 + $0x24] sm:$0xf0] }
  0x23   :  { %269 = vmatmul.bf16.vlgmr.msra.gmra.mxu0 %v87_v0  ;;  %1095 = vmatpush.bf16.msrb.mxu1 %v2016_v63  ;;  %v73_v34 = vld [vmem:[%s3836_s0 + $0x110] sm:$0xff]  ;;  %v2152_v35 = vor.u32 %v2540_v32, %v2151_v31  ;;  %v2000_v41 = vor.u32 %v2502_v38, %v1999_v37  ;;  %v2500_v44 = vld [vmem:[%s3837_s3 + $0x14] sm:$0xf0]  ;;  %v80_v45 = vld [vmem:[%s3836_s0 + $0x148] sm:$0xff] }
  0x24   :  { %407 = vmatmul.bf16.vlgmr.msra.gmra.mxu2 %v87_v0  ;;  %1150 = vmatpush.bf16.msrb.mxu0 %v2168_v51  ;;  %v2223_v0 = vld [vmem:[%s3837_s3 + $0x1e0] sm:$0xf]  ;;  %v1991_v43 = vld [vmem:[%s3837_s3 + $0x10] sm:$0xf]  ;;  %v82_v46 = vld [vmem:[%s3836_s0 + $0x158] sm:$0xff] }
  0x25   :  { %1179 = vmatpush.bf16.msrb.mxu2 %v2232_v47  ;;  %v2224_v2 = vor.u32 %v2558_v1, %v2223_v0  ;;  %v1992_v47 = vor.u32 %v2500_v44, %v1991_v43  ;;  %v108_v49 = vpack.c.bf16 %v82_v46, %v80_v45  ;;  %v1983_v50 = vld [vmem:[%s3837_s3] sm:$0xf]  ;;  %v2498_v51 = vld [vmem:[%s3837_s3 + $0x4] sm:$0xf0]  ;;  %v77_v60 = vld [vmem:[%s3836_s0 + $0x130] sm:$0xff] }
  0x26   :  { %1125 = vmatpush.bf16.msrb.mxu3 %v2072_v17  ;;  %v2063_v56 = vld [vmem:[%s3837_s3 + $0xa0] sm:$0xf]  ;;  %v2518_v57 = vld [vmem:[%s3837_s3 + $0xa4] sm:$0xf0] }
  0x27   :  { %v2064_v58 = vor.u32 %v2518_v57, %v2063_v56  ;;  %v75_v59 = vld [vmem:[%s3836_s0 + $0x120] sm:$0xff]  ;;  %v2554_v21 = vld [vmem:[%s3837_s3 + $0x1c4] sm:$0xf0] }
  0x28   :  { %1151 = vmatpush.bf16.msrb.mxu0 %v2160_v10  ;;  %v105_v1 = vpack.c.bf16 %v77_v60, %v75_v59  ;;  %v2143_v9 = vld [vmem:[%s3837_s3 + $0x140] sm:$0xf]  ;;  %v2538_v10 = vld [vmem:[%s3837_s3 + $0x144] sm:$0xf0] }
  0x29   :  { %1180 = vmatpush.bf16.msrb.mxu2 %v2224_v2  ;;  %v2055_v2 = vld [vmem:[%s3837_s3 + $0x90] sm:$0xf]  ;;  %v2207_v20 = vld [vmem:[%s3837_s3 + $0x1c0] sm:$0xf]  ;;  %v2530_v57 = vld [vmem:[%s3837_s3 + $0x104] sm:$0xf0] }
  0x2a   :  { %1959 = vmatmul.msk.bf16.gmra.mxu1 %vm217_vm1, %v92_v3  ;;  %1126 = vmatpush.bf16.msrb.mxu3 %v2064_v58  ;;  %v3145_v43 = vld [vmem:[%s3838_s2] ss:$0 sm:$0xff] }
  0x2b   :  { %v2111_v56 = vld [vmem:[%s3837_s3 + $0x100] sm:$0xf] }
  0x2c   :  { %1152 = vmatpush.bf16.msrb.mxu0 %v2152_v35  ;;  %v2112_v60 = vor.u32 %v2530_v57, %v2111_v56 }
  0x2f   :  { %1971 = vmatmul.msk.bf16.gmra.mxu3 %vm217_vm1, %v92_v3  ;;  %v63_v3 = vld [vmem:[%s3836_s0 + $0xc0] sm:$0xff] }
  0x30   :  { %v99_v5 = vpack.c.bf16 %v65_v4, %v63_v3  ;;  %v2516_v3 = vld [vmem:[%s3837_s3 + $0x94] sm:$0xf0]  ;;  %v84_v4 = vld [vmem:[%s3836_s0 + $0x168] sm:$0xff] }
  0x31   :  { %v2056_v6 = vor.u32 %v2516_v3, %v2055_v2  ;;  %v2552_v2 = vld [vmem:[%s3837_s3 + $0x1b4] sm:$0xf0] }
  0x33   :  { %274 = vmatmul.bf16.gmra.mxu0 %v89_v12  ;;  %1127 = vmatpush.bf16.msrb.mxu3 %v2056_v6  ;;  %v85_v6 = vld [vmem:[%s3836_s0 + $0x170] sm:$0xff] }
  0x34   :  { %412 = vmatmul.bf16.gmra.mxu2 %v89_v12 }
  0x3a   :  { %1960 = vmatmul.msk.bf16.gmra.mxu1 %vm217_vm1, %v94_v15 }
  0x3f   :  { %1972 = vmatmul.msk.bf16.gmra.mxu3 %vm217_vm1, %v94_v15  ;;  %v67_v15 = vld [vmem:[%s3836_s0 + $0xe0] sm:$0xff] }
  0x40   :  { %v101_v19 = vpack.c.bf16 %v69_v16, %v67_v15  ;;  %v2144_v15 = vor.u32 %v2538_v10, %v2143_v9  ;;  %v2514_v16 = vld [vmem:[%s3837_s3 + $0x84] sm:$0xf0]  ;;  %v2191_v10 = vld [vmem:[%s3837_s3 + $0x1a0] sm:$0xf] }
  0x42   :  { %1153 = vmatpush.bf16.msrb.mxu0 %v2144_v15 }
  0x43   :  { %279 = vmatmul.bf16.gmra.mxu0 %v91_v18 }
  0x44   :  { %417 = vmatmul.bf16.gmra.mxu2 %v91_v18 }
  0x4a   :  { %1961 = vmatmul.msk.bf16.gmra.mxu1 %vm217_vm1, %v96_v26 }
  0x4f   :  { %1973 = vmatmul.msk.bf16.gmra.mxu3 %vm217_vm1, %v96_v26  ;;  %v2504_v26 = vld [vmem:[%s3837_s3 + $0x34] sm:$0xf0] }
  0x50   :  { %v2008_v28 = vor.u32 %v2504_v26, %v2007_v25  ;;  %v2208_v25 = vor.u32 %v2554_v21, %v2207_v20 }
  0x52   :  { %1096 = vmatpush.bf16.msrb.mxu1 %v2008_v28  ;;  %v2135_v28 = vld [vmem:[%s3837_s3 + $0x130] sm:$0xf] }
  0x53   :  { %284 = vmatmul.bf16.gmra.mxu0 %v93_v30 }
  0x54   :  { %422 = vmatmul.bf16.gmra.mxu2 %v93_v30  ;;  %v2216_v30 = vor.u32 %v2556_v29, %v2215_v27  ;;  %v2536_v29 = vld [vmem:[%s3837_s3 + $0x134] sm:$0xf0] }
  0x56   :  { %1181 = vmatpush.bf16.msrb.mxu2 %v2216_v30  ;;  %1097 = vmatpush.bf16.msrb.mxu1 %v2000_v41  ;;  %v2136_v30 = vor.u32 %v2536_v29, %v2135_v28 }
  0x58   :  { %1154 = vmatpush.bf16.msrb.mxu0 %v2136_v30  ;;  %v2175_v30 = vld [vmem:[%s3837_s3 + $0x180] sm:$0xf] }
  0x5a   :  { %1962 = vmatmul.msk.bf16.gmra.mxu1 %vm217_vm1, %v98_v33  ;;  %1182 = vmatpush.bf16.msrb.mxu2 %v2208_v25 }
  0x5b   :  { %1098 = vmatpush.bf16.msrb.mxu1 %v1992_v47 }
  0x5f   :  { %1974 = vmatmul.msk.bf16.gmra.mxu3 %vm217_vm1, %v98_v33  ;;  %v71_v33 = vld [vmem:[%s3836_s0 + $0x100] sm:$0xff] }
  0x60   :  { %v103_v40 = vpack.c.bf16 %v73_v34, %v71_v33 }
  0x63   :  { %289 = vmatmul.bf16.gmra.mxu0 %v95_v42 }
  0x64   :  { %427 = vmatmul.bf16.gmra.mxu2 %v95_v42 }
  0x6a   :  { %1963 = vmatmul.msk.bf16.gmra.mxu1 %vm217_vm1, %v100_v48 }
  0x6f   :  { %1975 = vmatmul.msk.bf16.gmra.mxu3 %vm217_vm1, %v100_v48 }
  0x73   :  { %294 = vmatmul.bf16.gmra.mxu0 %v97_v54 }
  0x74   :  { %432 = vmatmul.bf16.gmra.mxu2 %v97_v54  ;;  %v1984_v54 = vor.u32 %v2498_v51, %v1983_v50  ;;  %v2119_v50 = vld [vmem:[%s3837_s3 + $0x110] sm:$0xf]  ;;  %v2532_v51 = vld [vmem:[%s3837_s3 + $0x114] sm:$0xf0] }
  0x76   :  { %1099 = vmatpush.bf16.msrb.mxu1 %v1984_v54 }
  0x7a   :  { %1964 = vmatmul.msk.bf16.gmra.mxu1 %vm217_vm1, %v102_v62 }
  0x7f   :  { %1976 = vmatmul.msk.bf16.gmra.mxu3 %vm217_vm1, %v102_v62 }
  0x83   :  { %299 = vmatmul.bf16.gmra.mxu0 %v99_v5 }
  0x84   :  { %437 = vmatmul.bf16.gmra.mxu2 %v99_v5  ;;  %v86_v5 = vld [vmem:[%s3836_s0 + $0x178] sm:$0xff] }
  0x85   :  { %v110_v8 = vpack.c.bf16 %v86_v5, %v84_v4  ;;  %v83_v5 = vld [vmem:[%s3836_s0 + $0x160] sm:$0xff] }
  0x87   :  { %v2980_v12 = vpop.f32.mrf.mxu1 }
  0x8a   :  { %1965 = vmatmul.msk.bf16.gmra.mxu1 %vm217_vm1, %v104_v11 }
  0x8f   :  { %v2995_v18 = vpop.f32.mrf.mxu1  ;;  %1977 = vmatmul.msk.bf16.gmra.mxu3 %vm217_vm1, %v104_v11  ;;  %v2047_v11 = vld [vmem:[%s3837_s3 + $0x80] sm:$0xf] }
  0x92   :  { %v3004_v22 = vpop.f32.mrf.mxu3 }
  0x93   :  { %304 = vmatmul.bf16.gmra.mxu0 %v101_v19 }
  0x94   :  { %442 = vmatmul.bf16.gmra.mxu2 %v101_v19 }
  0x97   :  { %v3006_v24 = vpop.f32.mrf.mxu1 }
  0x9a   :  { %1966 = vmatmul.msk.bf16.gmra.mxu1 %vm217_vm1, %v106_v23  ;;  %v479_v36 = vpop.f32.mrf.mxu3 }
  0x9f   :  { %v3039_v39 = vpop.f32.mrf.mxu1  ;;  %1978 = vmatmul.msk.bf16.gmra.mxu3 %vm217_vm1, %v106_v23  ;;  %v2048_v23 = vor.u32 %v2514_v16, %v2047_v11  ;;  %v2550_v11 = vld [vmem:[%s3837_s3 + $0x1a4] sm:$0xf0] }
  0xa0   :  { %v3041_v42 = vpop.f32.mrf.mxu0  ;;  %v2192_v16 = vor.u32 %v2550_v11, %v2191_v10 }
  0xa1   :  { %1128 = vmatpush.bf16.msrb.mxu3 %v2048_v23  ;;  %v340_v31 = vadd.f32 %v2980_v12, %v3041_v42  ;;  %v2534_v12 = vld [vmem:[%s3837_s3 + $0x124] sm:$0xf0]  ;;  %v109_v23 = vpack.c.bf16 %v85_v6, %v83_v5 }
  0xa2   :  { %v3056_v48 = vpop.f32.mrf.mxu3 }
  0xa3   :  { %309 = vmatmul.bf16.gmra.mxu0 %v103_v40 }
  0xa4   :  { %447 = vmatmul.bf16.gmra.mxu2 %v103_v40 }
  0xa7   :  { %v408_v52 = vpop.f32.mrf.mxu2  ;;  %v3064_v53 = vpop.f32.mrf.mxu1 }
  0xa8   :  { %v272_v55 = vpop.f32.mrf.mxu0  ;;  %v478_v26 = vadd.f32 %v3004_v22, %v408_v52  ;;  %v81_v22 = vld [vmem:[%s3836_s0 + $0x150] sm:$0xff]  ;;  %v2120_v52 = vor.u32 %v2532_v51, %v2119_v50 }
  0xa9   :  { %v342_v27 = vadd.f32 %v2995_v18, %v272_v55  ;;  %v79_v18 = vld [vmem:[%s3836_s0 + $0x140] sm:$0xff] }
  0xaa   :  { %1967 = vmatmul.msk.bf16.gmra.mxu1 %vm217_vm1, %v108_v49  ;;  %v484_v61 = vpop.f32.mrf.mxu3  ;;  %v107_v40 = vpack.c.bf16 %v81_v22, %v79_v18 }
  0xab   :  { %v537_v34 = vmax.f32 %v340_v31, %v342_v27  ;;  %v2548_v27 = vld [vmem:[%s3837_s3 + $0x194] sm:$0xf0]  ;;  %v2546_v31 = vld [vmem:[%s3837_s3 + $0x184] sm:$0xf0] }
  0xac   :  { %v2176_v22 = vor.u32 %v2546_v31, %v2175_v30 }
  0xaf   :  { %v410_v62 = vpop.f32.mrf.mxu2  ;;  %v3079_v63 = vpop.f32.mrf.mxu1  ;;  %1979 = vmatmul.msk.bf16.gmra.mxu3 %vm217_vm1, %v108_v49 }
  0xb0   :  { %v275_v0 = vpop.f32.mrf.mxu0  ;;  %v480_v17 = vadd.f32 %v479_v36, %v410_v62  ;;  %v2127_v36 = vld [vmem:[%s3837_s3 + $0x120] sm:$0xf] }
  0xb1   :  { %v2128_v41 = vor.u32 %v2534_v12, %v2127_v36 }
  0xb2   :  { %v3094_v7 = vpop.f32.mrf.mxu3  ;;  %v538_v32 = vmax.f32 %v478_v26, %v480_v17  ;;  %v2183_v26 = vld [vmem:[%s3837_s3 + $0x190] sm:$0xf] }
  0xb3   :  { %314 = vmatmul.bf16.gmra.mxu0 %v105_v1  ;;  %v2184_v28 = vor.u32 %v2548_v27, %v2183_v26  ;;  %v2507_v26 = vld [vmem:[%s3837_s3 + $0x54] sm:$0xf]  ;;  %v2025_v27 = vld [vmem:[%s3837_s3 + $0x58] sm:$0xf0] }
  0xb4   :  { %452 = vmatmul.bf16.gmra.mxu2 %v105_v1  ;;  %v561_v42 = vmax.f32 %v537_v34, %v538_v32  ;;  %1155 = vmatpush.bf16.msrb.mxu0 %v2128_v41  ;;  %v2199_v1 = vld [vmem:[%s3837_s3 + $0x1b0] sm:$0xf] }
  0xb5   :  { %v2200_v3 = vor.u32 %v2552_v2, %v2199_v1 }
  0xb7   :  { %v413_v13 = vpop.f32.mrf.mxu2  ;;  %v3105_v14 = vpop.f32.mrf.mxu1  ;;  %1183 = vmatpush.bf16.msrb.mxu2 %v2200_v3 }
  0xb8   :  { %v277_v19 = vpop.f32.mrf.mxu0  ;;  %v483_v44 = vadd.f32 %v3056_v48, %v413_v13  ;;  %1156 = vmatpush.bf16.msrb.mxu0 %v2120_v52 }
  0xb9   :  { %v347_v35 = vadd.f32 %v3039_v39, %v277_v19  ;;  %v345_v39 = vadd.f32 %v3006_v24, %v275_v0  ;;  %v577_v24 = vadd.f32 %v3145_v43, %v561_v42 }
  0xba   :  { %1968 = vmatmul.msk.bf16.gmra.mxu1 %vm217_vm1, %v110_v8  ;;  %v489_v33 = vpop.f32.mrf.mxu3 }
  0xbb   :  { %v539_v47 = vmax.f32 %v345_v39, %v347_v35  ;;  %1184 = vmatpush.bf16.msrb.mxu2 %v2192_v16  ;;  %v2509_v16 = vld [vmem:[%s3837_s3 + $0x64] sm:$0xf] }
  0xbc   :  { %1157 = vmatpush.bf16.msrb.mxu0 %v2112_v60 }
  0xbf   :  { %v415_v37 = vpop.f32.mrf.mxu2  ;;  %v3140_v38 = vpop.f32.mrf.mxu1  ;;  %1980 = vmatmul.msk.bf16.gmra.mxu3 %vm217_vm1, %v110_v8  ;;  %1185 = vmatpush.bf16.msrb.mxu2 %v2184_v28 }
  0xc0   :  { %v485_v45 = vadd.f32 %v484_v61, %v415_v37  ;;  %v280_v46 = vpop.f32.mrf.mxu0  ;;  %v589_v61 = vmax.f32 %v577_v24, 0.0 }
  0xc1   :  { %v350_v17 = vadd.f32 %v3064_v53, %v280_v46 }
  0xc2   :  { %v540_v49 = vmax.f32 %v483_v44, %v485_v45  ;;  %v492_v54 = vpop.f32.mrf.mxu3 }
  0xc3   :  { %319 = vmatmul.bf16.gmra.mxu0 %v107_v40  ;;  %1186 = vmatpush.bf16.msrb.mxu2 %v2176_v22 }
  0xc4   :  { %v562_v48 = vmax.f32 %v539_v47, %v540_v49  ;;  %457 = vmatmul.bf16.gmra.mxu2 %v107_v40 }
  0xc6   :  { %v578_v55 = vadd.f32 %v3145_v43, %v562_v48 }
  0xc7   :  { %v418_v58 = vpop.f32.mrf.mxu2  ;;  %v3164_v59 = vpop.f32.mrf.mxu1 }
  0xc8   :  { %v590_v62 = vmax.f32 %v578_v55, 0.0  ;;  %v282_v0 = vpop.f32.mrf.mxu0  ;;  %v488_v19 = vadd.f32 %v3094_v7, %v418_v58 }
  0xc9   :  { %v352_v9 = vadd.f32 %v3079_v63, %v282_v0 }
  0xca   :  { %v3172_v4 = vpack.c.bf16 %v590_v62, %v589_v61  ;;  %v494_v8 = vpop.f32.mrf.mxu3 }
  0xcb   :  { %v541_v63 = vmax.f32 %v350_v17, %v352_v9  ;;  %v2033_v17 = vld [vmem:[%s3837_s3 + $0x68] sm:$0xf0] }
  0xcc   :  { %1100 = vmatmul.bf16.vlgmr.msrb.gmra.mxu1 %v3172_v4 }
  0xcf   :  { %v420_v13 = vpop.f32.mrf.mxu2  ;;  %v361_v15 = vpop.f32.mrf.mxu1 }
  0xd0   :  { %v490_v20 = vadd.f32 %v489_v33, %v420_v13  ;;  %v285_v21 = vpop.f32.mrf.mxu0  ;;  %v2295_v13 = vld [vmem:[%s3837_s3 + $0x270] sm:$0xf] }
  0xd1   :  { %v355_v41 = vadd.f32 %v3105_v14, %v285_v21  ;;  %v2511_v14 = vld [vmem:[%s3837_s3 + $0x74] sm:$0xf] }
  0xd2   :  { %v542_v25 = vmax.f32 %v488_v19, %v490_v20  ;;  %v497_v53 = vpop.f32.mrf.mxu3  ;;  %v2287_v19 = vld [vmem:[%s3837_s3 + $0x260] sm:$0xf] }
  0xd3   :  { %324 = vmatmul.bf16.gmra.mxu0 %v109_v23 }
  0xd4   :  { %v563_v29 = vmax.f32 %v541_v63, %v542_v25  ;;  %462 = vmatmul.bf16.gmra.mxu2 %v109_v23  ;;  %v2036_v23 = vor.u32 %v2509_v16, %v2033_v17  ;;  %v2574_v63 = vld [vmem:[%s3837_s3 + $0x264] sm:$0xf0] }
  0xd5   :  { %v2288_v25 = vor.u32 %v2574_v63, %v2287_v19 }
  0xd6   :  { %v579_v7 = vadd.f32 %v3145_v43, %v563_v29  ;;  %v2028_v29 = vor.u32 %v2507_v26, %v2025_v27 }
  0xd7   :  { %v423_v32 = vpop.f32.mrf.mxu2  ;;  %v3203_v18 = vpop.f32.mrf.mxu1 }
  0xd8   :  { %v591_v33 = vmax.f32 %v579_v7, 0.0  ;;  %v287_v34 = vpop.f32.mrf.mxu0  ;;  %v493_v42 = vadd.f32 %v492_v54, %v423_v32 }
  0xd9   :  { %v357_v12 = vadd.f32 %v3140_v38, %v287_v34  ;;  %v2041_v38 = vld [vmem:[%s3837_s3 + $0x78] sm:$0xf0] }
  0xda   :  { %v3205_v35 = vpack.c.bf16 %v591_v33, %v590_v62  ;;  %v499_v36 = vpop.f32.mrf.mxu3  ;;  %v2044_v56 = vor.u32 %v2511_v14, %v2041_v38  ;;  %v2568_v38 = vld [vmem:[%s3837_s3 + $0x234] sm:$0xf0] }
  0xdb   :  { %v543_v45 = vmax.f32 %v355_v41, %v357_v12  ;;  %v2572_v12 = vld [vmem:[%s3837_s3 + $0x254] sm:$0xf0] }
  0xdc   :  { %1129 = vmatmul.bf16.vlgmr.msrb.gmra.mxu3 %v3205_v35 }
  0xdd   :  { %1237 = vmatpush.bf16.msra.mxu3 %v2044_v56  ;;  %v2009_v56 = vld [vmem:[%s3837_s3 + $0x38] sm:$0xf0] }
  0xdf   :  { %v425_v37 = vpop.f32.mrf.mxu2  ;;  %v366_v40 = vpop.f32.mrf.mxu1 }
  0xe0   :  { %v495_v39 = vadd.f32 %v494_v8, %v425_v37  ;;  %v290_v44 = vpop.f32.mrf.mxu0 }
  0xe1   :  { %v360_v60 = vadd.f32 %v3164_v59, %v290_v44  ;;  %v2576_v59 = vld [vmem:[%s3837_s3 + $0x274] sm:$0xf0]  ;;  %1238 = vmatpush.bf16.msra.mxu3 %v2036_v23  ;;  %v2570_v44 = vld [vmem:[%s3837_s3 + $0x244] sm:$0xf0] }
  0xe2   :  { %v544_v46 = vmax.f32 %v493_v42, %v495_v39  ;;  %v502_v49 = vpop.f32.mrf.mxu3  ;;  %v2271_v39 = vld [vmem:[%s3837_s3 + $0x240] sm:$0xf]  ;;  %v2562_v23 = vld [vmem:[%s3837_s3 + $0x204] sm:$0xf0] }
  0xe4   :  { %v564_v47 = vmax.f32 %v543_v45, %v544_v46  ;;  %v2272_v46 = vor.u32 %v2570_v44, %v2271_v39  ;;  %v2097_v39 = vld [vmem:[%s3837_s3 + $0xe8] sm:$0xf0] }
  0xe5   :  { %1239 = vmatpush.bf16.msra.mxu3 %v2028_v29  ;;  %v2501_v29 = vld [vmem:[%s3837_s3 + $0x24] sm:$0xf] }
  0xe6   :  { %v580_v50 = vadd.f32 %v3145_v43, %v564_v47 }
  0xe7   :  { %v428_v51 = vpop.f32.mrf.mxu2  ;;  %v3211_v52 = vpop.f32.mrf.mxu1 }
  0xe8   :  { %v592_v24 = vmax.f32 %v580_v50, 0.0  ;;  %v292_v48 = vpop.f32.mrf.mxu0  ;;  %v498_v61 = vadd.f32 %v497_v53, %v428_v51  ;;  %v2505_v51 = vld [vmem:[%s3837_s3 + $0x44] sm:$0xf] }
  0xe9   :  { %v362_v57 = vadd.f32 %v361_v15, %v292_v48  ;;  %v2296_v15 = vor.u32 %v2576_v59, %v2295_v13  ;;  %v2263_v48 = vld [vmem:[%s3837_s3 + $0x230] sm:$0xf] }
  0xea   :  { %v3213_v55 = vpack.c.bf16 %v592_v24, %v591_v33  ;;  %v504_v54 = vpop.f32.mrf.mxu3  ;;  %v2247_v59 = vld [vmem:[%s3837_s3 + $0x210] sm:$0xf] }
  0xeb   :  { %v545_v2 = vmax.f32 %v360_v60, %v362_v57  ;;  %1208 = vmatpush.bf16.msra.mxu1 %v2296_v15  ;;  %v2264_v57 = vor.u32 %v2568_v38, %v2263_v48  ;;  %v2564_v15 = vld [vmem:[%s3837_s3 + $0x214] sm:$0xf0]  ;;  %v2523_v48 = vld [vmem:[%s3837_s3 + $0xd4] sm:$0xf] }
  0xec   :  { %1105 = vmatmul.bf16.gmra.mxu1 %v3213_v55  ;;  %1158 = vmatmul.bf16.vlgmr.msrb.gmra.mxu0 %v3213_v55  ;;  %v2248_v16 = vor.u32 %v2564_v15, %v2247_v59 }
  0xef   :  { %v430_v58 = vpop.f32.mrf.mxu2  ;;  %v3224_v1 = vpop.f32.mrf.mxu1  ;;  %1209 = vmatpush.bf16.msra.mxu1 %v2288_v25 }
  0xf0   :  { %v500_v62 = vadd.f32 %v499_v36, %v430_v58  ;;  %v295_v0 = vpop.f32.mrf.mxu0  ;;  %v2279_v36 = vld [vmem:[%s3837_s3 + $0x250] sm:$0xf] }
  0xf1   :  { %v365_v30 = vadd.f32 %v3203_v18, %v295_v0  ;;  %v2280_v37 = vor.u32 %v2572_v12, %v2279_v36  ;;  %v2255_v0 = vld [vmem:[%s3837_s3 + $0x220] sm:$0xf]  ;;  %v1993_v36 = vld [vmem:[%s3837_s3 + $0x18] sm:$0xf0] }
  0xf2   :  { %v546_v3 = vmax.f32 %v498_v61, %v500_v62  ;;  %v3226_v6 = vpop.f32.mrf.mxu3 }
  0xf3   :  { %1210 = vmatpush.bf16.msra.mxu1 %v2280_v37 }
  0xf4   :  { %v565_v5 = vmax.f32 %v545_v2, %v546_v3  ;;  %v2566_v2 = vld [vmem:[%s3837_s3 + $0x224] sm:$0xf0] }
  0xf6   :  { %v581_v8 = vadd.f32 %v3145_v43, %v565_v5  ;;  %v2256_v5 = vor.u32 %v2566_v2, %v2255_v0 }
  0xf7   :  { %v433_v9 = vpop.f32.mrf.mxu2  ;;  %v3244_v20 = vpop.f32.mrf.mxu1  ;;  %1211 = vmatpush.bf16.msra.mxu1 %v2272_v46 }
  0xf8   :  { %v593_v10 = vmax.f32 %v581_v8, 0.0  ;;  %v297_v11 = vpop.f32.mrf.mxu0  ;;  %v503_v31 = vadd.f32 %v502_v49, %v433_v9 }
  0xf9   :  { %v367_v53 = vadd.f32 %v366_v40, %v297_v11 }
  0xfa   :  { %v3246_v21 = vpack.c.bf16 %v593_v10, %v592_v24  ;;  %v509_v28 = vpop.f32.mrf.mxu3  ;;  %v2017_v24 = vld [vmem:[%s3837_s3 + $0x48] sm:$0xf0] }
  0xfb   :  { %v547_v33 = vmax.f32 %v365_v30, %v367_v53  ;;  %v2020_v14 = vor.u32 %v2505_v51, %v2017_v24  ;;  %1212 = vmatpush.bf16.msra.mxu1 %v2264_v57  ;;  %v2001_v53 = vld [vmem:[%s3837_s3 + $0x28] sm:$0xf0]  ;;  %v2497_v57 = vld [vmem:[%s3837_s3 + $0x4] sm:$0xf] }
  0xfc   :  { %1134 = vmatmul.bf16.gmra.mxu3 %v3246_v21  ;;  %1187 = vmatmul.bf16.vlgmr.msrb.gmra.mxu2 %v3246_v21 }
  0xfd   :  { %1240 = vmatpush.bf16.msra.mxu3 %v2020_v14  ;;  %v2089_v14 = vld [vmem:[%s3837_s3 + $0xd8] sm:$0xf0] }
  0xfe   :  { %v2092_v38 = vor.u32 %v2523_v48, %v2089_v14 }
  0xff   :  { %v435_v7 = vpop.f32.mrf.mxu2  ;;  %v3266_v41 = vpop.f32.mrf.mxu1  ;;  %1213 = vmatpush.bf16.msra.mxu1 %v2256_v5  ;;  %v2169_v5 = vld [vmem:[%s3837_s3 + $0x178] sm:$0xf0] }
 0x100   :  { %v505_v32 = vadd.f32 %v504_v54, %v435_v7  ;;  %v300_v22 = vpop.f32.mrf.mxu0  ;;  %v2503_v54 = vld [vmem:[%s3837_s3 + $0x34] sm:$0xf]  ;;  %v2004_v7 = vor.u32 %v2501_v29, %v2001_v53 }
 0x101   :  { %v2012_v60 = vor.u32 %v2503_v54, %v2009_v56  ;;  %v370_v8 = vadd.f32 %v3211_v52, %v300_v22 }
 0x102   :  { %v548_v34 = vmax.f32 %v503_v31, %v505_v32  ;;  %v3268_v42 = vpop.f32.mrf.mxu3  ;;  %v2527_v31 = vld [vmem:[%s3837_s3 + $0xf4] sm:$0xf]  ;;  %v2105_v32 = vld [vmem:[%s3837_s3 + $0xf8] sm:$0xf0] }
 0x103   :  { %1241 = vmatpush.bf16.msra.mxu3 %v2012_v60  ;;  %1214 = vmatpush.bf16.msra.mxu1 %v2248_v16  ;;  %v2108_v22 = vor.u32 %v2527_v31, %v2105_v32  ;;  %v2521_v60 = vld [vmem:[%s3837_s3 + $0xc4] sm:$0xf]  ;;  %v2575_v16 = vld [vmem:[%s3837_s3 + $0x274] sm:$0xf]  ;;  %v2065_v32 = vld [vmem:[%s3837_s3 + $0xa8] sm:$0xf0] }
 0x104   :  { %v566_v40 = vmax.f32 %v547_v33, %v548_v34  ;;  %v2499_v34 = vld [vmem:[%s3837_s3 + $0x14] sm:$0xf] }
 0x105   :  { %v1996_v37 = vor.u32 %v2499_v34, %v1993_v36  ;;  %1266 = vmatpush.bf16.msra.mxu0 %v2108_v22 }
 0x106   :  { %v582_v18 = vadd.f32 %v3145_v43, %v566_v40 }
 0x107   :  { %v438_v45 = vpop.f32.mrf.mxu2  ;;  %v3300_v62 = vpop.f32.mrf.mxu1  ;;  %1242 = vmatpush.bf16.msra.mxu3 %v2004_v7 }
 0x108   :  { %v594_v47 = vmax.f32 %v582_v18, 0.0  ;;  %v302_v49 = vpop.f32.mrf.mxu0  ;;  %v508_v9 = vadd.f32 %v3226_v6, %v438_v45  ;;  %v2239_v6 = vld [vmem:[%s3837_s3 + $0x200] sm:$0xf]  ;;  %v2525_v18 = vld [vmem:[%s3837_s3 + $0xe4] sm:$0xf] }
 0x109   :  { %v372_v61 = vadd.f32 %v3224_v1, %v302_v49  ;;  %v2240_v25 = vor.u32 %v2562_v23, %v2239_v6  ;;  %v2100_v49 = vor.u32 %v2525_v18, %v2097_v39  ;;  %v2573_v18 = vld [vmem:[%s3837_s3 + $0x264] sm:$0xf] }
 0x10a   :  { %v3277_v50 = vpack.c.bf16 %v594_v47, %v593_v10  ;;  %v514_v58 = vpop.f32.mrf.mxu3 }
 0x10b   :  { %v549_v1 = vmax.f32 %v370_v8, %v372_v61  ;;  %1215 = vmatpush.bf16.msra.mxu1 %v2240_v25  ;;  %1243 = vmatpush.bf16.msra.mxu3 %v1996_v37  ;;  %v2541_v25 = vld [vmem:[%s3837_s3 + $0x164] sm:$0xf]  ;;  %v2559_v37 = vld [vmem:[%s3837_s3 + $0x1f4] sm:$0xf] }
 0x10c   :  { %1110 = vmatmul.bf16.gmra.mxu1 %v3277_v50  ;;  %1163 = vmatmul.bf16.gmra.mxu0 %v3277_v50 }
 0x10d   :  { %1267 = vmatpush.bf16.msra.mxu0 %v2100_v49 }
 0x10f   :  { %v440_v3 = vpop.f32.mrf.mxu2  ;;  %v3325_v27 = vpop.f32.mrf.mxu1 }
 0x110   :  { %v510_v10 = vadd.f32 %v509_v28, %v440_v3  ;;  %v305_v11 = vpop.f32.mrf.mxu0  ;;  %v2543_v3 = vld [vmem:[%s3837_s3 + $0x174] sm:$0xf] }
 0x111   :  { %v375_v44 = vadd.f32 %v3244_v20, %v305_v11  ;;  %1268 = vmatpush.bf16.msra.mxu0 %v2092_v38  ;;  %v2172_v8 = vor.u32 %v2543_v3, %v2169_v5  ;;  %v2049_v38 = vld [vmem:[%s3837_s3 + $0x88] sm:$0xf0] }
 0x112   :  { %v550_v13 = vmax.f32 %v508_v9, %v510_v10  ;;  %v3316_v19 = vpop.f32.mrf.mxu3  ;;  %v2081_v9 = vld [vmem:[%s3837_s3 + $0xc8] sm:$0xf0] }
 0x113   :  { %v2084_v11 = vor.u32 %v2521_v60, %v2081_v9  ;;  %1295 = vmatpush.bf16.msra.mxu2 %v2172_v8  ;;  %v2557_v60 = vld [vmem:[%s3837_s3 + $0x1e4] sm:$0xf]  ;;  %v2145_v5 = vld [vmem:[%s3837_s3 + $0x148] sm:$0xf0] }
 0x114   :  { %v567_v17 = vmax.f32 %v549_v1, %v550_v13  ;;  %v2519_v1 = vld [vmem:[%s3837_s3 + $0xb4] sm:$0xf]  ;;  %v2073_v13 = vld [vmem:[%s3837_s3 + $0xb8] sm:$0xf0] }
 0x115   :  { %1269 = vmatpush.bf16.msra.mxu0 %v2084_v11  ;;  %v2535_v11 = vld [vmem:[%s3837_s3 + $0x134] sm:$0xf] }
 0x116   :  { %v583_v52 = vadd.f32 %v3145_v43, %v567_v17  ;;  %v2297_v17 = vld [vmem:[%s3837_s3 + $0x278] sm:$0xf0] }
 0x117   :  { %v443_v63 = vpop.f32.mrf.mxu2  ;;  %v3358_v51 = vpop.f32.mrf.mxu1  ;;  %v2300_v23 = vor.u32 %v2575_v16, %v2297_v17  ;;  %v2281_v16 = vld [vmem:[%s3837_s3 + $0x258] sm:$0xf0] }
 0x118   :  { %v595_v26 = vmax.f32 %v583_v52, 0.0  ;;  %v307_v28 = vpop.f32.mrf.mxu0  ;;  %v513_v45 = vadd.f32 %v3268_v42, %v443_v63  ;;  %v2076_v52 = vor.u32 %v2519_v1, %v2073_v13  ;;  %v2137_v1 = vld [vmem:[%s3837_s3 + $0x138] sm:$0xf0] }
 0x119   :  { %v377_v12 = vadd.f32 %v3266_v41, %v307_v28  ;;  %v2517_v28 = vld [vmem:[%s3837_s3 + $0xa4] sm:$0xf] }
 0x11a   :  { %v3333_v30 = vpack.c.bf16 %v595_v26, %v594_v47  ;;  %v519_v33 = vpop.f32.mrf.mxu3  ;;  %1270 = vmatpush.bf16.msra.mxu0 %v2076_v52  ;;  %v2068_v22 = vor.u32 %v2517_v28, %v2065_v32  ;;  %v2140_v52 = vor.u32 %v2535_v11, %v2137_v1 }
 0x11b   :  { %v551_v41 = vmax.f32 %v375_v44, %v377_v12  ;;  %v2515_v12 = vld [vmem:[%s3837_s3 + $0x94] sm:$0xf]  ;;  %v2289_v44 = vld [vmem:[%s3837_s3 + $0x268] sm:$0xf0] }
 0x11c   :  { %1139 = vmatmul.bf16.gmra.mxu3 %v3333_v30  ;;  %1192 = vmatmul.bf16.gmra.mxu2 %v3333_v30 }
 0x11e   :  { %1271 = vmatpush.bf16.msra.mxu0 %v2068_v22  ;;  %v2569_v22 = vld [vmem:[%s3837_s3 + $0x244] sm:$0xf] }
 0x11f   :  { %v445_v40 = vpop.f32.mrf.mxu2  ;;  %v3400_v59 = vpop.f32.mrf.mxu1 }
 0x120   :  { %v515_v46 = vadd.f32 %v514_v58, %v445_v40  ;;  %v310_v47 = vpop.f32.mrf.mxu0  ;;  %v1985_v58 = vld [vmem:[%s3837_s3 + $0x8] sm:$0xf0]  ;;  %v2233_v40 = vld [vmem:[%s3837_s3 + $0x1f8] sm:$0xf0] }
 0x121   :  { %v1988_v2 = vor.u32 %v2497_v57, %v1985_v58  ;;  %v380_v29 = vadd.f32 %v3300_v62, %v310_v47  ;;  %v2057_v62 = vld [vmem:[%s3837_s3 + $0x98] sm:$0xf0]  ;;  %v2236_v39 = vor.u32 %v2559_v37, %v2233_v40  ;;  %v2553_v37 = vld [vmem:[%s3837_s3 + $0x1c4] sm:$0xf]  ;;  %v2209_v40 = vld [vmem:[%s3837_s3 + $0x1c8] sm:$0xf0] }
 0x122   :  { %v552_v24 = vmax.f32 %v513_v45, %v515_v46  ;;  %v3366_v42 = vpop.f32.mrf.mxu3  ;;  %v2060_v45 = vor.u32 %v2515_v12, %v2057_v62  ;;  %v2153_v46 = vld [vmem:[%s3837_s3 + $0x158] sm:$0xf0] }
 0x123   :  { %1244 = vmatpush.bf16.msra.mxu3 %v1988_v2  ;;  %1324 = vmatpush.bf16.msrb.mxu1 %v2236_v39 }
 0x124   :  { %v568_v20 = vmax.f32 %v551_v41, %v552_v24  ;;  %v2292_v41 = vor.u32 %v2573_v18, %v2289_v44  ;;  %1272 = vmatpush.bf16.msra.mxu0 %v2060_v45  ;;  %v2529_v18 = vld [vmem:[%s3837_s3 + $0x104] sm:$0xf]  ;;  %v2212_v45 = vor.u32 %v2553_v37, %v2209_v40  ;;  %v2241_v40 = vld [vmem:[%s3837_s3 + $0x208] sm:$0xf0] }
 0x126   :  { %v3369_v54 = vadd.f32 %v3145_v43, %v568_v20  ;;  %v2513_v20 = vld [vmem:[%s3837_s3 + $0x84] sm:$0xf] }
 0x127   :  { %v448_v56 = vpop.f32.mrf.mxu2  ;;  %1353 = vmatpush.bf16.msrb.mxu3 %v2300_v23  ;;  %v3451_v47 = vpop.f32.mrf.mxu1  ;;  %v2052_v3 = vor.u32 %v2513_v20, %v2049_v38  ;;  %v2129_v23 = vld [vmem:[%s3837_s3 + $0x128] sm:$0xf0]  ;;  %v2551_v20 = vld [vmem:[%s3837_s3 + $0x1b4] sm:$0xf]  ;;  %v2201_v38 = vld [vmem:[%s3837_s3 + $0x1b8] sm:$0xf0] }
 0x128   :  { %v596_v61 = vmax.f32 %v3369_v54, 0.0  ;;  %v312_v0 = vpop.f32.mrf.mxu0  ;;  %v518_v53 = vadd.f32 %v3316_v19, %v448_v56  ;;  %v2539_v19 = vld [vmem:[%s3837_s3 + $0x154] sm:$0xf]  ;;  %v2537_v56 = vld [vmem:[%s3837_s3 + $0x144] sm:$0xf] }
 0x129   :  { %v382_v6 = vadd.f32 %v3325_v27, %v312_v0  ;;  %v2156_v24 = vor.u32 %v2539_v19, %v2153_v46  ;;  %v2225_v0 = vld [vmem:[%s3837_s3 + $0x1e8] sm:$0xf0]  ;;  %v2148_v9 = vor.u32 %v2537_v56, %v2145_v5  ;;  %1273 = vmatpush.bf16.msra.mxu0 %v2052_v3 }
 0x12a   :  { %v3392_v10 = vpack.c.bf16 %v596_v61, %v595_v26  ;;  %v3404_v15 = vpop.f32.mrf.mxu3  ;;  %v2161_v26 = vld [vmem:[%s3837_s3 + $0x168] sm:$0xf0]  ;;  %v2228_v2 = vor.u32 %v2557_v60, %v2225_v0  ;;  %v2567_v60 = vld [vmem:[%s3837_s3 + $0x234] sm:$0xf]  ;;  %v2265_v0 = vld [vmem:[%s3837_s3 + $0x238] sm:$0xf0] }
 0x12b   :  { %v2164_v31 = vor.u32 %v2541_v25, %v2161_v26  ;;  %v553_v34 = vmax.f32 %v380_v29, %v382_v6  ;;  %1354 = vmatpush.bf16.msrb.mxu3 %v2292_v41  ;;  %v2113_v46 = vld [vmem:[%s3837_s3 + $0x108] sm:$0xf0] }
 0x12c   :  { %1115 = vmatmul.bf16.gmra.mxu1 %v3392_v10  ;;  %1168 = vmatmul.bf16.gmra.mxu0 %v3392_v10  ;;  %v2193_v5 = vld [vmem:[%s3837_s3 + $0x1a8] sm:$0xf0] }
 0x12d   :  { %1296 = vmatpush.bf16.msra.mxu2 %v2164_v31  ;;  %1325 = vmatpush.bf16.msrb.mxu1 %v2228_v2  ;;  %v2531_v31 = vld [vmem:[%s3837_s3 + $0x114] sm:$0xf] }
 0x12f   :  { %v450_v63 = vpop.f32.mrf.mxu2 }
 0x130   :  { %v520_v7 = vadd.f32 %v519_v33, %v450_v63  ;;  %v315_v27 = vpop.f32.mrf.mxu0  ;;  %v391_v63 = vpop.f32.mrf.mxu1 }
 0x131   :  { %1297 = vmatpush.bf16.msra.mxu2 %v2156_v24  ;;  %v385_v13 = vadd.f32 %v3358_v51, %v315_v27  ;;  %v2217_v27 = vld [vmem:[%s3837_s3 + $0x1d8] sm:$0xf0]  ;;  %v2116_v24 = vor.u32 %v2529_v18, %v2113_v46 }
 0x132   :  { %v554_v36 = vmax.f32 %v518_v53, %v520_v7  ;;  %v3456_v14 = vpop.f32.mrf.mxu3  ;;  %v2555_v7 = vld [vmem:[%s3837_s3 + $0x1d4] sm:$0xf] }
 0x134   :  { %v569_v33 = vmax.f32 %v553_v34, %v554_v36  ;;  %v2273_v34 = vld [vmem:[%s3837_s3 + $0x248] sm:$0xf0]  ;;  %v2121_v36 = vld [vmem:[%s3837_s3 + $0x118] sm:$0xf0] }
 0x135   :  { %1298 = vmatpush.bf16.msra.mxu2 %v2148_v9  ;;  %v2276_v12 = vor.u32 %v2569_v22, %v2273_v34  ;;  %v2124_v19 = vor.u32 %v2531_v31, %v2121_v36 }
 0x136   :  { %v3454_v49 = vadd.f32 %v3145_v43, %v569_v33 }
 0x137   :  { %v453_v48 = vpop.f32.mrf.mxu2 }
 0x138   :  { %v597_v57 = vmax.f32 %v3454_v49, 0.0  ;;  %v317_v58 = vpop.f32.mrf.mxu0  ;;  %v523_v17 = vadd.f32 %v3366_v42, %v453_v48  ;;  %v394_v49 = vpop.f32.mrf.mxu1 }
 0x139   :  { %v387_v54 = vadd.f32 %v3400_v59, %v317_v58  ;;  %v2533_v59 = vld [vmem:[%s3837_s3 + $0x124] sm:$0xf]  ;;  %1299 = vmatpush.bf16.msra.mxu2 %v2140_v52  ;;  %v2204_v58 = vor.u32 %v2551_v20, %v2201_v38 }
 0x13a   :  { %v3479_v8 = vpack.c.bf16 %v597_v57, %v596_v61  ;;  %v2571_v61 = vld [vmem:[%s3837_s3 + $0x254] sm:$0xf]  ;;  %v529_v29 = vpop.f32.mrf.mxu3  ;;  %v2132_v53 = vor.u32 %v2533_v59, %v2129_v23  ;;  %v2545_v52 = vld [vmem:[%s3837_s3 + $0x184] sm:$0xf] }
 0x13b   :  { %v2284_v51 = vor.u32 %v2571_v61, %v2281_v16  ;;  %v555_v25 = vmax.f32 %v385_v13, %v387_v54  ;;  %v2257_v61 = vld [vmem:[%s3837_s3 + $0x228] sm:$0xf0]  ;;  %v2547_v16 = vld [vmem:[%s3837_s3 + $0x194] sm:$0xf] }
 0x13c   :  { %1144 = vmatmul.bf16.gmra.mxu3 %v3479_v8  ;;  %1197 = vmatmul.bf16.gmra.mxu2 %v3479_v8 }
 0x13d   :  { %1216 = vmatmul.bf16.vlgmr.msra.gmra.mxu1 %v3277_v50  ;;  %1355 = vmatpush.bf16.msrb.mxu3 %v2284_v51  ;;  %v2185_v51 = vld [vmem:[%s3837_s3 + $0x198] sm:$0xf0] }
 0x13e   :  { %1300 = vmatpush.bf16.msra.mxu2 %v2132_v53 }
 0x13f   :  { %v455_v6 = vpop.f32.mrf.mxu2 }
 0x140   :  { %v525_v26 = vadd.f32 %v3404_v15, %v455_v6  ;;  %v320_v28 = vpop.f32.mrf.mxu0  ;;  %v2220_v15 = vor.u32 %v2555_v7, %v2217_v27  ;;  %v2177_v6 = vld [vmem:[%s3837_s3 + $0x188] sm:$0xf0]  ;;  %v396_v59 = vpop.f32.mrf.mxu1 }
 0x141   :  { %1356 = vmatpush.bf16.msrb.mxu3 %v2276_v12  ;;  %v390_v56 = vadd.f32 %v3451_v47, %v320_v28  ;;  %v2268_v47 = vor.u32 %v2567_v60, %v2265_v0  ;;  %v2180_v28 = vor.u32 %v2545_v52, %v2177_v6 }
 0x142   :  { %v556_v42 = vmax.f32 %v523_v17, %v525_v26  ;;  %1326 = vmatpush.bf16.msrb.mxu1 %v2220_v15  ;;  %1301 = vmatpush.bf16.msra.mxu2 %v2124_v19  ;;  %v532_v48 = vpop.f32.mrf.mxu3  ;;  %v2249_v15 = vld [vmem:[%s3837_s3 + $0x218] sm:$0xf0] }
 0x144   :  { %v570_v32 = vmax.f32 %v555_v25, %v556_v42 }
 0x145   :  { %1357 = vmatpush.bf16.msrb.mxu3 %v2268_v47 }
 0x146   :  { %v586_v62 = vadd.f32 %v3145_v43, %v570_v32  ;;  %1327 = vmatpush.bf16.msrb.mxu1 %v2212_v45  ;;  %1302 = vmatpush.bf16.msra.mxu2 %v2116_v24  ;;  %v2563_v32 = vld [vmem:[%s3837_s3 + $0x214] sm:$0xf] }
 0x147   :  { %v458_v33 = vpop.f32.mrf.mxu2  ;;  %v2252_v36 = vor.u32 %v2563_v32, %v2249_v15 }
 0x148   :  { %v598_v39 = vmax.f32 %v586_v62, 0.0  ;;  %v322_v44 = vpop.f32.mrf.mxu0  ;;  %v528_v2 = vadd.f32 %v3456_v14, %v458_v33  ;;  %v2565_v14 = vld [vmem:[%s3837_s3 + $0x224] sm:$0xf] }
 0x149   :  { %v2260_v17 = vor.u32 %v2565_v14, %v2257_v61  ;;  %v1101_v22 = vpop.f32.mrf.mxu1 }
 0x14a   :  { %v3537_v41 = vpack.c.bf16 %v598_v39, %v597_v57  ;;  %v392_v57 = vadd.f32 %v391_v63, %v322_v44  ;;  %1328 = vmatpush.bf16.msrb.mxu1 %v2204_v58  ;;  %v2188_v63 = vor.u32 %v2547_v16, %v2185_v51  ;;  %v534_v25 = vpop.f32.mrf.mxu3 }
 0x14b   :  { %1358 = vmatpush.bf16.msrb.mxu3 %v2260_v17 }
 0x14c   :  { %1173 = vmatmul.bf16.gmra.mxu0 %v3537_v41  ;;  %1245 = vmatmul.bf16.vlgmr.msra.gmra.mxu3 %v3172_v4  ;;  %v2549_v4 = vld [vmem:[%s3837_s3 + $0x1a4] sm:$0xf]  ;;  %v557_v9 = vmax.f32 %v390_v56, %v392_v57 }
 0x14d   :  { %1221 = vmatmul.bf16.gmra.mxu1 %v3392_v10  ;;  %v2196_v13 = vor.u32 %v2549_v4, %v2193_v5 }
 0x14f   :  { %v460_v3 = vpop.f32.mrf.mxu2  ;;  %1329 = vmatpush.bf16.msrb.mxu1 %v2196_v13  ;;  %1359 = vmatpush.bf16.msrb.mxu3 %v2252_v36 }
 0x150   :  { %v530_v11 = vadd.f32 %v529_v29, %v460_v3  ;;  %v325_v1 = vpop.f32.mrf.mxu0 }
 0x151   :  { %v395_v27 = vadd.f32 %v394_v49, %v325_v1  ;;  %v1103_v20 = vpop.f32.mrf.mxu1 }
 0x152   :  { %v558_v54 = vmax.f32 %v528_v2, %v530_v11 }
 0x153   :  { %1330 = vmatpush.bf16.msrb.mxu1 %v2188_v63 }
 0x154   :  { %v571_v23 = vmax.f32 %v557_v9, %v558_v54 }
 0x156   :  { %v587_v26 = vadd.f32 %v3145_v43, %v571_v23 }
 0x157   :  { %v463_v29 = vpop.f32.mrf.mxu2  ;;  %1331 = vmatpush.bf16.msrb.mxu1 %v2180_v28 }
 0x158   :  { %v599_v42 = vmax.f32 %v587_v26, 0.0  ;;  %v327_v53 = vpop.f32.mrf.mxu0  ;;  %v533_v34 = vadd.f32 %v532_v48, %v463_v29 }
 0x159   :  { %v397_v31 = vadd.f32 %v396_v59, %v327_v53 }
 0x15a   :  { %v3581_v7 = vpack.c.bf16 %v599_v42, %v598_v39 }
 0x15b   :  { %v559_v19 = vmax.f32 %v395_v27, %v397_v31 }
 0x15c   :  { %1202 = vmatmul.bf16.gmra.mxu2 %v3581_v7  ;;  %1250 = vmatmul.bf16.gmra.mxu3 %v3213_v55 }
 0x15d   :  { %1226 = vmatmul.bf16.gmra.mxu1 %v3537_v41  ;;  %1274 = vmatmul.bf16.vlgmr.msra.gmra.mxu0 %v3205_v35  ;;  %v2561_v35 = vld [vmem:[%s3837_s3 + $0x204] sm:$0xf] }
 0x15e   :  { %v2244_v18 = vor.u32 %v2561_v35, %v2241_v40 }
 0x15f   :  { %v465_v12 = vpop.f32.mrf.mxu2  ;;  %v1130_v62 = vpop.f32.mrf.mxu3 }
 0x160   :  { %v535_v33 = vadd.f32 %v534_v25, %v465_v12  ;;  %v1131_v37 = vadd.f32 %v1130_v62, %v1101_v22  ;;  %1360 = vmatpush.bf16.msrb.mxu3 %v2244_v18 }
 0x162   :  { %v560_v39 = vmax.f32 %v533_v34, %v535_v33 }
 0x164   :  { %v572_v44 = vmax.f32 %v559_v19, %v560_v39 }
 0x166   :  { %v588_v45 = vadd.f32 %v3145_v43, %v572_v44 }
 0x167   :  { %v1132_v38 = vpop.f32.mrf.mxu3 }
 0x168   :  { %v600_v46 = vmax.f32 %v588_v45, 0.0 }
 0x169   :  { %v1159_v49 = vpop.f32.mrf.mxu0  ;;  %v1106_v56 = vpop.f32.mrf.mxu1 }
 0x16a   :  { %v1160_v24 = vadd.f32 %v1159_v49, %v1131_v37  ;;  %v611_v48 = vpack.c.bf16 %v600_v46, %v599_v42 }
 0x16c   :  { %1255 = vmatmul.bf16.gmra.mxu3 %v3277_v50  ;;  %1303 = vmatmul.bf16.vlgmr.msra.gmra.mxu2 %v3213_v55  ;;  %v1133_v55 = vadd.f32 %v1132_v38, %v1103_v20 }
 0x16d   :  { %1231 = vmatmul.bf16.gmra.mxu1 %v611_v48  ;;  %1279 = vmatmul.bf16.gmra.mxu0 %v3246_v21 }
 0x171   :  { %v1161_v0 = vpop.f32.mrf.mxu0  ;;  %v1108_v2 = vpop.f32.mrf.mxu1 }
 0x172   :  { %v1162_v47 = vadd.f32 %v1161_v0, %v1133_v55  ;;  %v2583_v55 = vld [vmem:[%s3841_s5 + $0x30] sm:$0xff] }
 0x17c   :  { %1260 = vmatmul.bf16.gmra.mxu3 %v3392_v10  ;;  %1308 = vmatmul.bf16.gmra.mxu2 %v3277_v50 }
 0x17d   :  { %1284 = vmatmul.bf16.gmra.mxu0 %v3333_v30  ;;  %1332 = vmatmul.bf16.vlgmr.msrb.gmra.mxu1 %v3246_v21 }
 0x17f   :  { %v1135_v43 = vpop.f32.mrf.mxu3  ;;  %v1188_v57 = vpop.f32.mrf.mxu2 }
 0x180   :  { %v1136_v58 = vadd.f32 %v1135_v43, %v1106_v56  ;;  %v1189_v60 = vadd.f32 %v1188_v57, %v1160_v24  ;;  %v2592_v56 = vld [vmem:[%s3841_s5 + $0x78] sm:$0xff] }
 0x181   :  { %v2584_v43 = vld [vmem:[%s3841_s5 + $0x38] sm:$0xff]  ;;  %1683 = vmatpush.bf16.msrb.mxu2 %v2592_v56  ;;  %v2595_v56 = vld [vmem:[%s3841_s5 + $0x90] sm:$0xff] }
 0x182   :  { %1670 = vmatpush.bf16.msrb.mxu0 %v2584_v43  ;;  %v2607_v43 = vld [vmem:[%s3841_s5 + $0xf0] sm:$0xff] }
 0x186   :  { %1671 = vmatpush.bf16.msrb.mxu0 %v2583_v55  ;;  %v3733_v55 = vld [vmem:[%s3839_s4] ss:$0 sm:$0xff] }
 0x187   :  { %v1137_v3 = vpop.f32.mrf.mxu3  ;;  %v1190_v4 = vpop.f32.mrf.mxu2 }
 0x188   :  { %v1138_v5 = vadd.f32 %v1137_v3, %v1108_v2  ;;  %v1191_v9 = vadd.f32 %v1190_v4, %v1162_v47  ;;  %v2591_v3 = vld [vmem:[%s3841_s5 + $0x70] sm:$0xff]  ;;  %v2582_v4 = vld [vmem:[%s3841_s5 + $0x28] sm:$0xff] }
 0x189   :  { %v1164_v11 = vpop.f32.mrf.mxu0  ;;  %v1111_v54 = vpop.f32.mrf.mxu1  ;;  %1684 = vmatpush.bf16.msrb.mxu2 %v2591_v3 }
 0x18a   :  { %v1165_v1 = vadd.f32 %v1164_v11, %v1136_v58  ;;  %1672 = vmatpush.bf16.msrb.mxu0 %v2582_v4  ;;  %v2594_v4 = vld [vmem:[%s3841_s5 + $0x88] sm:$0xff] }
 0x18c   :  { %1313 = vmatmul.bf16.gmra.mxu2 %v3392_v10  ;;  %1361 = vmatmul.bf16.vlgmr.msrb.gmra.mxu3 %v3277_v50 }
 0x18d   :  { %1289 = vmatmul.bf16.gmra.mxu0 %v3479_v8  ;;  %1337 = vmatmul.bf16.gmra.mxu1 %v3333_v30 }
 0x191   :  { %v1166_v21 = vpop.f32.mrf.mxu0  ;;  %v1113_v51 = vpop.f32.mrf.mxu1 }
 0x192   :  { %v1167_v13 = vadd.f32 %v1166_v21, %v1138_v5  ;;  %v2590_v21 = vld [vmem:[%s3841_s5 + $0x68] sm:$0xff] }
 0x193   :  { %1685 = vmatpush.bf16.msrb.mxu2 %v2590_v21 }
 0x19c   :  { %1318 = vmatmul.bf16.gmra.mxu2 %v3537_v41  ;;  %1366 = vmatmul.bf16.gmra.mxu3 %v3392_v10 }
 0x19d   :  { %1342 = vmatmul.bf16.gmra.mxu1 %v3479_v8 }
 0x19f   :  { %v1140_v14 = vpop.f32.mrf.mxu3  ;;  %v1193_v61 = vpop.f32.mrf.mxu2 }
 0x1a0   :  { %v1141_v16 = vadd.f32 %v1140_v14, %v1111_v54  ;;  %v1194_v17 = vadd.f32 %v1193_v61, %v1165_v1  ;;  %v2579_v61 = vld [vmem:[%s3841_s5 + $0x10] sm:$0xff] }
 0x1a7   :  { %v1142_v52 = vpop.f32.mrf.mxu3  ;;  %v1195_v50 = vpop.f32.mrf.mxu2 }
 0x1a8   :  { %v1143_v6 = vadd.f32 %v1142_v52, %v1113_v51  ;;  %v1196_v59 = vadd.f32 %v1195_v50, %v1167_v13  ;;  %v2580_v13 = vld [vmem:[%s3841_s5 + $0x18] sm:$0xff]  ;;  %v2578_v51 = vld [vmem:[%s3841_s5 + $0x8] sm:$0xff] }
 0x1a9   :  { %v1116_v23 = vpop.f32.mrf.mxu1  ;;  %v1169_v30 = vpop.f32.mrf.mxu0 }
 0x1aa   :  { %v1170_v63 = vadd.f32 %v1169_v30, %v1141_v16  ;;  %v2588_v30 = vld [vmem:[%s3841_s5 + $0x58] sm:$0xff] }
 0x1ac   :  { %1371 = vmatmul.bf16.gmra.mxu3 %v3537_v41 }
 0x1ad   :  { %1347 = vmatmul.bf16.gmra.mxu1 %v3581_v7 }
 0x1b1   :  { %v1118_v25 = vpop.f32.mrf.mxu1  ;;  %v1171_v10 = vpop.f32.mrf.mxu0 }
 0x1b2   :  { %v1172_v26 = vadd.f32 %v1171_v10, %v1143_v6  ;;  %v2589_v6 = vld [vmem:[%s3841_s5 + $0x60] sm:$0xff] }
 0x1b3   :  { %1686 = vmatpush.bf16.msrb.mxu2 %v2589_v6 }
 0x1b7   :  { %1687 = vmatpush.bf16.msrb.mxu2 %v2588_v30 }
 0x1ba   :  { %v1217_v8 = vpop.f32.mrf.mxu1 }
 0x1bb   :  { %v3616_v28 = vadd.f32 %v1217_v8, %v1189_v60  ;;  %v2587_v8 = vld [vmem:[%s3841_s5 + $0x50] sm:$0xff] }
 0x1bc   :  { %1376 = vmatmul.bf16.gmra.mxu3 %v611_v48  ;;  %1688 = vmatpush.bf16.msrb.mxu2 %v2587_v8 }
 0x1bf   :  { %v1145_v29 = vpop.f32.mrf.mxu3  ;;  %v1198_v42 = vpop.f32.mrf.mxu2 }
 0x1c0   :  { %v1146_v53 = vadd.f32 %v1145_v29, %v1116_v23  ;;  %v1199_v27 = vadd.f32 %v1198_v42, %v1170_v63  ;;  %v2600_v63 = vld [vmem:[%s3841_s5 + $0xb8] sm:$0xff]  ;;  %v2599_v29 = vld [vmem:[%s3841_s5 + $0xb0] sm:$0xff]  ;;  %v2586_v42 = vld [vmem:[%s3841_s5 + $0x48] sm:$0xff] }
 0x1c1   :  { %1689 = vmatpush.bf16.msrb.mxu2 %v2586_v42 }
 0x1c2   :  { %v1219_v31 = vpop.f32.mrf.mxu1 }
 0x1c3   :  { %v3618_v32 = vadd.f32 %v1219_v31, %v1191_v9  ;;  %v2581_v9 = vld [vmem:[%s3841_s5 + $0x20] sm:$0xff] }
 0x1c4   :  { %1673 = vmatpush.bf16.msrb.mxu0 %v2581_v9  ;;  %v2606_v9 = vld [vmem:[%s3841_s5 + $0xe8] sm:$0xff] }
 0x1c5   :  { %v1382_v15 = vmax.f32 %v3616_v28, %v3618_v32  ;;  %v2605_v28 = vld [vmem:[%s3841_s5 + $0xe0] sm:$0xff] }
 0x1c7   :  { %v1147_v41 = vpop.f32.mrf.mxu3  ;;  %v1200_v22 = vpop.f32.mrf.mxu2 }
 0x1c8   :  { %v1148_v7 = vadd.f32 %v1147_v41, %v1118_v25  ;;  %v1201_v34 = vadd.f32 %v1200_v22, %v1172_v26  ;;  %1674 = vmatpush.bf16.msrb.mxu0 %v2580_v13  ;;  %v2585_v22 = vld [vmem:[%s3841_s5 + $0x40] sm:$0xff] }
 0x1c9   :  { %v1174_v36 = vpop.f32.mrf.mxu0  ;;  %1690 = vmatpush.bf16.msrb.mxu2 %v2585_v22 }
 0x1ca   :  { %v1175_v12 = vadd.f32 %v1174_v36, %v1146_v53  ;;  %v1222_v62 = vpop.f32.mrf.mxu1  ;;  %v2598_v53 = vld [vmem:[%s3841_s5 + $0xa8] sm:$0xff] }
 0x1cb   :  { %v3622_v19 = vadd.f32 %v1222_v62, %v1194_v17 }
 0x1cc   :  { %1675 = vmatpush.bf16.msrb.mxu0 %v2579_v61  ;;  %v2593_v61 = vld [vmem:[%s3841_s5 + $0x80] sm:$0xff] }
 0x1cf   :  { %v3624_v33 = vpop.f32.mrf.mxu3 }
 0x1d0   :  { %1676 = vmatpush.bf16.msrb.mxu0 %v2578_v51 }
 0x1d1   :  { %v1176_v37 = vpop.f32.mrf.mxu0 }
 0x1d2   :  { %v1177_v35 = vadd.f32 %v1176_v37, %v1148_v7  ;;  %v1224_v40 = vpop.f32.mrf.mxu1  ;;  %v2597_v7 = vld [vmem:[%s3841_s5 + $0xa0] sm:$0xff] }
 0x1d3   :  { %v3626_v18 = vadd.f32 %v1224_v40, %v1196_v59  ;;  %v2577_v59 = vld [vmem:[%s3841_s5] sm:$0xff]  ;;  %v2608_v40 = vld [vmem:[%s3841_s5 + $0xf8] sm:$0xff] }
 0x1d4   :  { %1677 = vmatpush.bf16.msrb.mxu0 %v2577_v59  ;;  %1709 = vmatpush.bf16.msra.mxu2 %v2608_v40  ;;  %v2604_v59 = vld [vmem:[%s3841_s5 + $0xd8] sm:$0xff] }
 0x1d5   :  { %v1384_v39 = vmax.f32 %v3622_v19, %v3626_v18 }
 0x1d7   :  { %v3630_v44 = vpop.f32.mrf.mxu3 }
 0x1d8   :  { %1696 = vmatpush.bf16.msra.mxu0 %v2600_v63  ;;  %1710 = vmatpush.bf16.msra.mxu2 %v2607_v43 }
 0x1da   :  { %v1227_v45 = vpop.f32.mrf.mxu1  ;;  %v1275_v16 = vpop.f32.mrf.mxu0 }
 0x1db   :  { %v3632_v46 = vadd.f32 %v1227_v45, %v1199_v27  ;;  %v1276_v36 = vadd.f32 %v1275_v16, %v3624_v33 }
 0x1dc   :  { %1697 = vmatpush.bf16.msra.mxu0 %v2599_v29  ;;  %1711 = vmatpush.bf16.msra.mxu2 %v2606_v9 }
 0x1df   :  { %v1203_v49 = vpop.f32.mrf.mxu2  ;;  %v3634_v24 = vpop.f32.mrf.mxu3 }
 0x1e0   :  { %v1204_v48 = vadd.f32 %v1203_v49, %v1175_v12  ;;  %1698 = vmatpush.bf16.msra.mxu0 %v2598_v53  ;;  %1712 = vmatpush.bf16.msra.mxu2 %v2605_v28  ;;  %v2602_v53 = vld [vmem:[%s3841_s5 + $0xc8] sm:$0xff] }
 0x1e2   :  { %v1229_v20 = vpop.f32.mrf.mxu1  ;;  %v1277_v23 = vpop.f32.mrf.mxu0 }
 0x1e3   :  { %v3636_v38 = vadd.f32 %v1229_v20, %v1201_v34  ;;  %v1278_v12 = vadd.f32 %v1277_v23, %v3630_v44 }
 0x1e4   :  { %1699 = vmatpush.bf16.msra.mxu0 %v2597_v7  ;;  %1713 = vmatpush.bf16.msra.mxu2 %v2604_v59 }
 0x1e5   :  { %v1386_v57 = vmax.f32 %v3632_v46, %v3636_v38 }
 0x1e7   :  { %v1205_v58 = vpop.f32.mrf.mxu2  ;;  %v3646_v60 = vpop.f32.mrf.mxu3 }
 0x1e8   :  { %v1206_v0 = vadd.f32 %v1205_v58, %v1177_v35  ;;  %v2596_v35 = vld [vmem:[%s3841_s5 + $0x98] sm:$0xff] }
 0x1e9   :  { %1700 = vmatpush.bf16.msra.mxu0 %v2596_v35 }
 0x1ea   :  { %v1232_v2 = vpop.f32.mrf.mxu1  ;;  %v1280_v27 = vpop.f32.mrf.mxu0 }
 0x1eb   :  { %v3651_v47 = vadd.f32 %v1232_v2, %v1204_v48 }
 0x1ed   :  { %1701 = vmatpush.bf16.msra.mxu0 %v2595_v56 }
 0x1ef   :  { %v3659_v5 = vpop.f32.mrf.mxu3  ;;  %v1304_v17 = vpop.f32.mrf.mxu2 }
 0x1f0   :  { %v1305_v62 = vadd.f32 %v1304_v17, %v1276_v36 }
 0x1f1   :  { %1702 = vmatpush.bf16.msra.mxu0 %v2594_v4 }
 0x1f2   :  { %v1234_v11 = vpop.f32.mrf.mxu1  ;;  %v1282_v48 = vpop.f32.mrf.mxu0 }
 0x1f3   :  { %v3664_v1 = vadd.f32 %v1234_v11, %v1206_v0  ;;  %v1283_v16 = vadd.f32 %v1282_v48, %v3646_v60  ;;  %v2603_v60 = vld [vmem:[%s3841_s5 + $0xd0] sm:$0xff] }
 0x1f4   :  { %1714 = vmatpush.bf16.msra.mxu2 %v2603_v60 }
 0x1f5   :  { %v1388_v54 = vmax.f32 %v3651_v47, %v3664_v1  ;;  %1703 = vmatpush.bf16.msra.mxu0 %v2593_v61  ;;  %v2613_v47 = vld [vmem:[%s3842_s7 + $0x20] sm:$0xff]  ;;  %v2612_v1 = vld [vmem:[%s3842_s7 + $0x18] sm:$0xff] }
 0x1f7   :  { %v3674_v14 = vpop.f32.mrf.mxu3  ;;  %v1306_v25 = vpop.f32.mrf.mxu2 }
 0x1f8   :  { %v1307_v37 = vadd.f32 %v1306_v25, %v1278_v12  ;;  %1715 = vmatpush.bf16.msra.mxu2 %v2602_v53 }
 0x1fa   :  { %v1333_v52 = vpop.f32.mrf.mxu1  ;;  %v1285_v32 = vpop.f32.mrf.mxu0 }
 0x1fb   :  { %v1334_v45 = vadd.f32 %v1333_v52, %v1305_v62  ;;  %v1286_v36 = vadd.f32 %v1285_v32, %v3659_v5  ;;  %v1738_v62 = vld [vmem:[%s3842_s7 + $0x38] sm:$0xf] }
 0x1fc   :  { %v1772_v35 = vunpack.c.l.b16 %v1738_v62 }
 0x1ff   :  { %v3682_v50 = vpop.f32.mrf.mxu3  ;;  %v1309_v31 = vpop.f32.mrf.mxu2 }
 0x202   :  { %v1335_v10 = vpop.f32.mrf.mxu1  ;;  %v1287_v29 = vpop.f32.mrf.mxu0 }
 0x203   :  { %v1336_v49 = vadd.f32 %v1335_v10, %v1307_v37  ;;  %v1288_v19 = vadd.f32 %v1287_v29, %v3674_v14 }
 0x207   :  { %v3696_v26 = vpop.f32.mrf.mxu3  ;;  %v1311_v58 = vpop.f32.mrf.mxu2 }
 0x208   :  { %v1312_v6 = vadd.f32 %v1311_v58, %v1283_v16 }
 0x20a   :  { %v1338_v34 = vpop.f32.mrf.mxu1  ;;  %v1290_v37 = vpop.f32.mrf.mxu0 }
 0x20b   :  { %v1291_v9 = vadd.f32 %v1290_v37, %v3682_v50 }
 0x20f   :  { %v1362_v41 = vpop.f32.mrf.mxu3  ;;  %v1314_v51 = vpop.f32.mrf.mxu2 }
 0x210   :  { %v1363_v20 = vadd.f32 %v1362_v41, %v1334_v45 }
 0x212   :  { %v1340_v2 = vpop.f32.mrf.mxu1 }
 0x213   :  { %v1341_v63 = vadd.f32 %v1340_v2, %v1312_v6  ;;  %v2614_v6 = vld [vmem:[%s3842_s7 + $0x28] sm:$0xff] }
 0x217   :  { %v1364_v33 = vpop.f32.mrf.mxu3 }
 0x218   :  { %v1365_v44 = vadd.f32 %v1364_v33, %v1336_v49  ;;  %v1780_v33 = vpack.c.b16 %v1772_v35, %v1772_v35  ;;  %v2624_v35 = vld [vmem:[%s3843_s8] ss:$0 sm:$0xff] }
 0x21a   :  { %v1383_v0 = vmax.f32 %v1363_v20, %v1365_v44  ;;  %v1343_v23 = vpop.f32.mrf.mxu1  ;;  %v1794_v44 = vsel %vm1792_vm2, %v1780_v33, 0 }
 0x21b   :  { %1796 = vmatpush.bf16.msra.mxu1 %v1794_v44 }
 0x21c   :  { %v1390_v3 = vmax.f32 %v1382_v15, %v1383_v0  ;;  %v1281_v15 = vadd.f32 %v1280_v27, %v3634_v24  ;;  %v1316_v27 = vpop.f32.mrf.mxu2  ;;  %v1292_v0 = vpop.f32.mrf.mxu0 }
 0x21d   :  { %v1317_v12 = vadd.f32 %v1316_v27, %v1288_v19  ;;  %v2619_v27 = vld [vmem:[%s3844_s9 + $0x18] sm:$0xff] }
 0x21e   :  { %v1398_v11 = vadd.f32 %v3733_v55, %v1390_v3  ;;  %v1310_v52 = vadd.f32 %v1309_v31, %v1281_v15 }
 0x21f   :  { %v1367_v21 = vpop.f32.mrf.mxu3 }
 0x220   :  { %v1402_v13 = vmax.f32 %v1398_v11, 0.0  ;;  %v1339_v30 = vadd.f32 %v1338_v34, %v1310_v52  ;;  %v2601_v34 = vld [vmem:[%s3841_s5 + $0xc0] sm:$0xff]  ;;  %v1293_v11 = vadd.f32 %v1292_v0, %v3696_v26  ;;  %v2615_v26 = vld [vmem:[%s3842_s7 + $0x30] sm:$0xff] }
 0x221   :  { %1716 = vmatpush.bf16.msra.mxu2 %v2601_v34  ;;  %1797 = vmatpush.bf16.msra.mxu1 %v2615_v26 }
 0x222   :  { %v1406_v17 = vpack.c.bf16 %v1402_v13, %v1402_v13  ;;  %v1368_v10 = vadd.f32 %v1367_v21, %v1339_v30  ;;  %v1345_v41 = vpop.f32.mrf.mxu1  ;;  %v2609_v30 = vld [vmem:[%s3842_s7] sm:$0xff] }
 0x223   :  { %v1346_v45 = vadd.f32 %v1345_v41, %v1317_v12  ;;  %v2623_v41 = vld [vmem:[%s3840_s6] ss:$0 sm:$0xff] }
 0x224   :  { %1678 = vmatmul.bf16.vlgmr.msrb.gmra.mxu0 %v1406_v17  ;;  %v1319_v49 = vpop.f32.mrf.mxu2 }
 0x225   :  { %v1320_v61 = vadd.f32 %v1319_v49, %v1291_v9  ;;  %1798 = vmatpush.bf16.msra.mxu1 %v2614_v6 }
 0x227   :  { %v1369_v25 = vpop.f32.mrf.mxu3 }
 0x228   :  { %v1370_v24 = vadd.f32 %v1369_v25, %v1341_v63 }
 0x229   :  { %1799 = vmatpush.bf16.msra.mxu1 %v2613_v47 }
 0x22a   :  { %v1385_v8 = vmax.f32 %v1368_v10, %v1370_v24  ;;  %v1348_v14 = vpop.f32.mrf.mxu1  ;;  %v1821_v10 = vld [vmem:[%s3844_s9 + $0x28] sm:$0x3] }
 0x22b   :  { %v1349_v32 = vadd.f32 %v1348_v14, %v1320_v61  ;;  %v1847_v24 = vunpack.c.l.b16 %v1821_v10 }
 0x22c   :  { %v1391_v42 = vmax.f32 %v1384_v39, %v1385_v8  ;;  %v1315_v39 = vadd.f32 %v1314_v51, %v1286_v36  ;;  %v1321_v4 = vpop.f32.mrf.mxu2  ;;  %v2616_v36 = vld [vmem:[%s3844_s9] sm:$0xff] }
 0x22d   :  { %v1322_v28 = vadd.f32 %v1321_v4, %v1293_v11  ;;  %1800 = vmatpush.bf16.msra.mxu1 %v2612_v1  ;;  %v1853_v8 = vpack.c.b16 %v1847_v24, %v1847_v24 }
 0x22e   :  { %v1399_v31 = vadd.f32 %v3733_v55, %v1391_v42  ;;  %v1344_v40 = vadd.f32 %v1343_v23, %v1315_v39  ;;  %v2610_v23 = vld [vmem:[%s3842_s7 + $0x8] sm:$0xff]  ;;  %v2620_v42 = vld [vmem:[%s3844_s9 + $0x20] sm:$0xff] }
 0x22f   :  { %v1372_v22 = vpop.f32.mrf.mxu3  ;;  %v1865_v29 = vsel %vm1863_vm3, %v1853_v8, 0 }
 0x230   :  { %v1403_v7 = vmax.f32 %v1399_v31, 0.0  ;;  %v1373_v5 = vadd.f32 %v1372_v22, %v1344_v40  ;;  %1869 = vmatpush.bf16.msra.mxu3 %v1865_v29  ;;  %v2618_v31 = vld [vmem:[%s3844_s9 + $0x10] sm:$0xff]  ;;  %v2617_v22 = vld [vmem:[%s3844_s9 + $0x8] sm:$0xff] }
 0x232   :  { %v1407_v18 = vpack.c.bf16 %v1403_v7, %v1403_v7  ;;  %v1350_v13 = vpop.f32.mrf.mxu1 }
 0x233   :  { %v1351_v15 = vadd.f32 %v1350_v13, %v1322_v28 }
 0x234   :  { %1691 = vmatmul.bf16.vlgmr.msrb.gmra.mxu2 %v1407_v18  ;;  %1870 = vmatpush.bf16.msra.mxu3 %v2620_v42 }
 0x237   :  { %v1374_v48 = vpop.f32.mrf.mxu3 }
 0x238   :  { %v1375_v20 = vadd.f32 %v1374_v48, %v1346_v45  ;;  %1871 = vmatpush.bf16.msra.mxu3 %v2619_v27 }
 0x23a   :  { %v1387_v56 = vmax.f32 %v1373_v5, %v1375_v20  ;;  %v2625_v5 = vld [vmem:[%s3845_s10] ss:$0 sm:$0xff] }
 0x23c   :  { %v1392_v43 = vmax.f32 %v1386_v57, %v1387_v56  ;;  %1872 = vmatpush.bf16.msra.mxu3 %v2618_v31 }
 0x23e   :  { %v1400_v58 = vadd.f32 %v3733_v55, %v1392_v43 }
 0x23f   :  { %v1377_v2 = vpop.f32.mrf.mxu3 }
 0x240   :  { %v1404_v3 = vmax.f32 %v1400_v58, 0.0  ;;  %v1378_v46 = vadd.f32 %v1377_v2, %v1349_v32  ;;  %1873 = vmatpush.bf16.msra.mxu3 %v2617_v22 }
 0x242   :  { %v1408_v21 = vpack.c.bf16 %v1404_v3, %v1404_v3 }
 0x244   :  { %1704 = vmatmul.bf16.vlgmr.msra.gmra.mxu0 %v1408_v21  ;;  %1874 = vmatpush.bf16.msra.mxu3 %v2616_v36 }
 0x247   :  { %v1379_v16 = vpop.f32.mrf.mxu3 }
 0x248   :  { %v1380_v38 = vadd.f32 %v1379_v16, %v1351_v15 }
 0x24a   :  { %v1389_v57 = vmax.f32 %v1378_v46, %v1380_v38 }
 0x24c   :  { %v1393_v17 = vmax.f32 %v1388_v54, %v1389_v57 }
 0x24e   :  { %v1401_v51 = vadd.f32 %v3733_v55, %v1393_v17  ;;  %v2611_v55 = vld [vmem:[%s3842_s7 + $0x10] sm:$0xff] }
 0x24f   :  { %1801 = vmatpush.bf16.msra.mxu1 %v2611_v55 }
 0x250   :  { %v1405_v50 = vmax.f32 %v1401_v51, 0.0 }
 0x252   :  { %v1409_v52 = vpack.c.bf16 %v1405_v50, %v1405_v50 }
 0x253   :  { %1802 = vmatpush.bf16.msra.mxu1 %v2610_v23 }
 0x254   :  { %1717 = vmatmul.bf16.vlgmr.msra.gmra.mxu2 %v1409_v52 }
 0x257   :  { %1803 = vmatpush.bf16.msra.mxu1 %v2609_v30 }
 0x2a1   :  { %v1679_v54 = vpop.f32.mrf.mxu0 }
 0x2a2   :  { %v1680_v7 = vadd.f32 %v2623_v41, %v1679_v54 }
 0x2a9   :  { %v1681_v59 = vpop.f32.mrf.mxu0 }
 0x2b7   :  { %v1692_v63 = vpop.f32.mrf.mxu2 }
 0x2b8   :  { %v1693_v34 = vadd.f32 %v1692_v63, %v1680_v7 }
 0x2bf   :  { %v1694_v25 = vpop.f32.mrf.mxu2 }
 0x2c1   :  { %v1705_v60 = vpop.f32.mrf.mxu0 }
 0x2c2   :  { %v1706_v19 = vadd.f32 %v1705_v60, %v1693_v34 }
 0x2c9   :  { %v1707_v53 = vpop.f32.mrf.mxu0 }
 0x2d7   :  { %v1718_v18 = vpop.f32.mrf.mxu2 }
 0x2d8   :  { %v1719_v39 = vadd.f32 %v1718_v18, %v1706_v19 }
 0x2da   :  { %v1722_v12 = vmax.f32 %v1719_v39, 0.0 }
 0x2dc   :  { %v1723_v62 = vpack.c.bf16 %v1722_v12, %v1722_v12 }
 0x2de   :  { %2457 = vmatmul.msk.bf16.vlgmr.msra.gmra.mxu1 %vm1788_vm4, %v1723_v62 }
 0x2df   :  { %v1720_v37 = vpop.f32.mrf.mxu2 }
 0x35b   :  { %v1805_v40 = vpop.f32.mrf.mxu1 }
 0x35c   :  { %v1806_v45 = vadd.f32 %v2624_v35, %v1805_v40 }
 0x35e   :  { %v1809_v49 = vmax.f32 %v1806_v45, 0.0 }
 0x360   :  { %v1810_v48 = vpack.c.bf16 %v1809_v49, %v1809_v49 }
 0x362   :  { %2478 = vmatmul.msk.bf16.vlgmr.msra.gmra.mxu3 %vm1859_vm5, %v1810_v48 }
 0x363   :  { %v1807_v33 = vpop.f32.mrf.mxu1 }
 0x3e5   :  { %v1876_v20 = vpop.f32.mrf.mxu3 }
 0x3e6   :  { %v1877_v14 = vadd.f32 %v2625_v5, %v1876_v20 }
 0x3e8   :  { %1880 = vst [vmem:[%s3846_s11] sm:$0xff] %v1877_v14 }
 0x3ed   :  { %v1878_v44 = vpop.f32.mrf.mxu3 }

</bundles_post_ra>
